<compile_context>
chip_gen: v7x
topology: tpu7x:2x2x1
jax: 0.10.0
libtpu: 0.0.40
codegen_flags: <defaults>
</compile_context>

<pallas_src>
import jax
import jax.numpy as jnp
from jax.experimental import pallas as pl
from jax.experimental.pallas import tpu as pltpu


def _round_up(x: int, m: int) -> int:
    return ((x + m - 1) // m) * m


def sentence_embed_kernel(hidden_ref, mask_ref, w_ref, b_ref, out_ref,
                          acc_ref, den_ref):
    """Grid = (batch tiles, seq tiles); seq axis is the reduction ('arbitrary')."""
    j = pl.program_id(1)

    @pl.when(j == 0)
    def _init():
        acc_ref[...] = jnp.zeros_like(acc_ref)
        den_ref[...] = jnp.zeros_like(den_ref)

    TB, TS, E = hidden_ref.shape
    H = w_ref.shape[1]

    # ---- encoder head: single 2-D MXU matmul over the flattened tile ----
    h2d = hidden_ref[...].reshape(TB * TS, E)                       # bf16 [TB*TS, E]
    tok = jnp.dot(h2d, w_ref[...],
                  preferred_element_type=jnp.float32)               # [TB*TS, H] f32
    tok = jnp.tanh(tok + b_ref[...])                                # bias [1, H] bcast
    # Kept in f32 (strict bf16-autocast would round `tok` here; tighter precision).

    # ---- masked partial sum over this S tile ----
    mask = mask_ref[...]                                            # f32 [TB, TS]
    mtok = (tok.reshape(TB, TS, H) * mask[:, :, None]).reshape(TB * TS, H)

    # Per-batch sum over S as a 2-D MXU matmul with a block-diagonal 0/1 selector
    # (keeps the reduction off the VPU/XLU sublane-reduce path).
    row_b = jax.lax.broadcasted_iota(jnp.int32, (TB, TB * TS), 0)
    col_k = jax.lax.broadcasted_iota(jnp.int32, (TB, TB * TS), 1)
    lo = row_b * TS
    sel = jnp.where((col_k >= lo) & (col_k < lo + TS), 1.0, 0.0).astype(jnp.float32)
    acc_ref[...] += jnp.dot(sel, mtok, preferred_element_type=jnp.float32)  # [TB, H]
    den_ref[...] += jnp.sum(mask, axis=1, keepdims=True)            # [TB, 1]

    @pl.when(j == pl.num_programs(1) - 1)
    def _finalize():
        denom = jnp.maximum(den_ref[...], 1e-9)                     # clamp(min=1e-9)
        # uniform per-row scale; any reciprocal error cancels in the L2 normalize
        emb = acc_ref[...] * pl.reciprocal(denom, approx=True)      # [TB, H]
        ssq = jnp.sum(emb * emb, axis=1, keepdims=True)
        inv_norm = jax.lax.rsqrt(jnp.maximum(ssq, 1e-24))           # == /max(norm,1e-12)
        out_ref[...] = (emb * inv_norm).astype(out_ref.dtype)


def sentence_transformer_forward(input_ids, attention_mask, embed_table, w, b,
                                 *, tile_b: int = 8, tile_s: int = 128):
    """Returns {'sentence_embedding': [B, H] float32} — mirrors the torch module."""
    B, S = input_ids.shape
    V, E = embed_table.shape
    H = w.shape[1]

    # Lane/sublane padding: E, H -> multiples of 128 (lane-dense MXU + unmasked
    # stores); B -> tile_b sublanes; S -> tile_s so the mask block is (8,128)-legal.
    E_pad = _round_up(E, 128)
    H_pad = _round_up(H, 128)
    B_pad = _round_up(B, tile_b)
    S_pad = _round_up(S, tile_s)

    # Feed the encoder in bf16 (autocast) so the [B,S,E] stream is half the bytes.
    # TODO(synk): for large vocab, fuse the gather into the kernel via scalar-prefetched
    # input_ids + a row-gather index_map instead of materializing `hidden` in HBM.
    table = jnp.pad(embed_table, ((0, 0), (0, E_pad - E))).astype(jnp.bfloat16)
    w_p = jnp.pad(w, ((0, E_pad - E), (0, H_pad - H))).astype(jnp.bfloat16)
    b_p = jnp.pad(b, ((0, 0), (0, H_pad - H))).astype(jnp.float32)
    ids_p = jnp.pad(input_ids, ((0, B_pad - B), (0, S_pad - S)))
    mask_p = jnp.pad(attention_mask, ((0, B_pad - B), (0, S_pad - S))).astype(jnp.float32)

    hidden = jnp.take(table, ids_p, axis=0)          # [B_pad, S_pad, E_pad] bf16

    grid = (B_pad // tile_b, S_pad // tile_s)

    out = pl.pallas_call(
        sentence_embed_kernel,
        out_shape=jax.ShapeDtypeStruct((B_pad, H_pad), jnp.float32),
        grid_spec=pltpu.PrefetchScalarGridSpec(
            num_scalar_prefetch=0,
            grid=grid,
            in_specs=[
                pl.BlockSpec((tile_b, tile_s, E_pad), lambda i, j: (i, j, 0)),  # hidden
                pl.BlockSpec((tile_b, tile_s), lambda i, j: (i, j)),            # mask
                pl.BlockSpec((E_pad, H_pad), lambda i, j: (0, 0)),              # weight
                pl.BlockSpec((1, H_pad), lambda i, j: (0, 0)),                  # bias
            ],
            out_specs=pl.BlockSpec((tile_b, H_pad), lambda i, j: (i, 0)),
            scratch_shapes=[
                pltpu.VMEM((tile_b, H_pad), jnp.float32),   # masked-sum accumulator
                pltpu.VMEM((tile_b, 1), jnp.float32),       # mask-count accumulator
            ],
        ),
        compiler_params=pltpu.CompilerParams(
            dimension_semantics=("parallel", "arbitrary"),
            vmem_limit_bytes=32 * 1024 * 1024,
        ),
    )(hidden, mask_p, w_p, b_p)

    return {"sentence_embedding": out[:B, :H]}


def reference_forward(input_ids, attention_mask, embed_table, w, b):
    """Pure-JAX reference matching the PyTorch (autocast) semantics."""
    hidden = jnp.take(embed_table.astype(jnp.bfloat16), input_ids, axis=0)
    tok = jnp.einsum("bse,eh->bsh", hidden, w.astype(jnp.bfloat16),
                     preferred_element_type=jnp.float32)
    tok = jnp.tanh(tok + b.astype(jnp.float32)[None, :, :]).astype(jnp.bfloat16)
    mask = attention_mask.astype(jnp.float32)[:, :, None]
    summed = jnp.sum(tok.astype(jnp.float32) * mask, axis=1)
    denom = jnp.maximum(jnp.sum(mask, axis=1), 1e-9)
    emb = summed / denom
    norm = jnp.sqrt(jnp.sum(emb * emb, axis=1, keepdims=True))
    return emb / jnp.maximum(norm, 1e-12)


if __name__ == "__main__":
    # Small, deterministic synthetic setup (seq matches the module's max_seq_length scale).
    B, S, E, H, VOCAB = 4, 256, 32, 48, 64

    key = jax.random.PRNGKey(0)
    k_emb, k_w, k_b, k_ids = jax.random.split(key, 4)

    embed_table = jax.random.normal(k_emb, (VOCAB, E), dtype=jnp.float32) * 0.1
    w = jax.random.normal(k_w, (E, H), dtype=jnp.float32) * 0.1
    b = jax.random.normal(k_b, (1, H), dtype=jnp.float32) * 0.01

    input_ids = jax.random.randint(k_ids, (B, S), minval=0, maxval=VOCAB,
                                   dtype=jnp.int32)
    # attention_mask with varying amounts of padding per sequence
    lengths = jnp.array([256, 130, 64, 1], dtype=jnp.int32)
    attention_mask = (jnp.arange(S, dtype=jnp.int32)[None, :]
                      < lengths[:, None]).astype(jnp.int32)

    out = sentence_transformer_forward(input_ids, attention_mask,
                                       embed_table, w, b)
    emb = jax.block_until_ready(out["sentence_embedding"])

    ref = reference_forward(input_ids, attention_mask, embed_table, w, b)
    assert emb.shape == (B, H)
    assert jnp.allclose(emb, ref, atol=1e-2, rtol=1e-2), "mismatch vs reference"
    # sentence embeddings should be unit-norm
    assert jnp.allclose(jnp.linalg.norm(emb, axis=1), 1.0, atol=1e-3)

    print("KERNEL_OK")
</pallas_src>

<mosaic_0001>
module attributes {stable_mosaic.version = 11 : i64} {
  func.func @sentence_embed_kernel(%arg0: i32, %arg1: i32, %arg2: memref<8x128x128xbf16, #tpu.memory_space<vmem>>, %arg3: memref<8x128xf32, #tpu.memory_space<vmem>>, %arg4: memref<128x128xbf16, #tpu.memory_space<vmem>>, %arg5: memref<1x128xf32, #tpu.memory_space<vmem>>, %arg6: memref<8x128xf32, #tpu.memory_space<vmem>>, %arg7: memref<8x128xf32, #tpu.memory_space<vmem>>, %arg8: memref<8x1xf32, #tpu.memory_space<vmem>>) attributes {dimension_semantics = [#tpu.dimension_semantics<parallel>, #tpu.dimension_semantics<arbitrary>], iteration_bounds = array<i64: 1, 2>, scalar_prefetch = 0 : i64, scratch_operands = 2 : i64, tpu.core_type = #tpu.core_type<tc>, window_params = [{transform_indices = @transform_0, window_bounds = array<i64: 8, 128, 128>}, {transform_indices = @transform_1, window_bounds = array<i64: 8, 128>}, {pipeline_mode = #tpu.pipeline_mode<synchronous>, transform_indices = @transform_2, window_bounds = array<i64: 128, 128>}, {pipeline_mode = #tpu.pipeline_mode<synchronous>, transform_indices = @transform_3, window_bounds = array<i64: 1, 128>}, {transform_indices = @transform_4, window_bounds = array<i64: 8, 128>}]} {
    %c0_i32 = arith.constant 0 : i32
    %0 = arith.cmpi eq, %arg1, %c0_i32 : i32
    %1 = arith.extui %0 : i1 to i32
    %c0_i32_0 = arith.constant 0 : i32
    %2 = arith.cmpi ne, %1, %c0_i32_0 : i32
    scf.if %2 {
      %cst_23 = arith.constant 0.000000e+00 : f32
      %41 = vector.broadcast %cst_23 : f32 to vector<8x128xf32>
      %c0_24 = arith.constant 0 : index
      %c0_25 = arith.constant 0 : index
      %42 = vector.load %arg7[%c0_24, %c0_25] : memref<8x128xf32, #tpu.memory_space<vmem>>, vector<8x128xf32>
      tpu.vector_store %arg7[%c0_24, %c0_25], %41 {strides = array<i32>} : memref<8x128xf32, #tpu.memory_space<vmem>>, vector<8x128xf32>,
      %cst_26 = arith.constant 0.000000e+00 : f32
      %43 = vector.broadcast %cst_26 : f32 to vector<8x1xf32>
      %c0_27 = arith.constant 0 : index
      %c0_28 = arith.constant 0 : index
      %44 = vector.load %arg8[%c0_27, %c0_28] : memref<8x1xf32, #tpu.memory_space<vmem>>, vector<8x1xf32>
      tpu.vector_store %arg8[%c0_27, %c0_28], %43 {strides = array<i32>} : memref<8x1xf32, #tpu.memory_space<vmem>>, vector<8x1xf32>,
    } else {
    }
    %c0 = arith.constant 0 : index
    %c0_1 = arith.constant 0 : index
    %c0_2 = arith.constant 0 : index
    %3 = vector.load %arg2[%c0, %c0_1, %c0_2] : memref<8x128x128xbf16, #tpu.memory_space<vmem>>, vector<8x128x128xbf16>
    %4 = vector.shape_cast %3 : vector<8x128x128xbf16> to vector<1024x128xbf16>
    %c0_3 = arith.constant 0 : index
    %c0_4 = arith.constant 0 : index
    %5 = vector.load %arg4[%c0_3, %c0_4] : memref<128x128xbf16, #tpu.memory_space<vmem>>, vector<128x128xbf16>
    %cst = arith.constant dense<0.000000e+00> : vector<1024x128xf32>
    %6 = tpu.matmul %4, %5, %cst {dimension_numbers = #tpu.dot_dimension_numbers<[1], [0], [0], [1], [0, 0, 1, 1], [], []>} : vector<1024x128xbf16>, vector<128x128xbf16>, vector<1024x128xf32> -> vector<1024x128xf32>
    %c0_5 = arith.constant 0 : index
    %c0_6 = arith.constant 0 : index
    %7 = vector.load %arg5[%c0_5, %c0_6] : memref<1x128xf32, #tpu.memory_space<vmem>>, vector<1x128xf32>
    %8 = vector.broadcast %7 : vector<1x128xf32> to vector<1024x128xf32>
    %9 = arith.addf %6, %8 : vector<1024x128xf32>
    %10 = math.tanh %9 : vector<1024x128xf32>
    %c0_7 = arith.constant 0 : index
    %c0_8 = arith.constant 0 : index
    %11 = vector.load %arg3[%c0_7, %c0_8] : memref<8x128xf32, #tpu.memory_space<vmem>>, vector<8x128xf32>
    %12 = vector.shape_cast %10 : vector<1024x128xf32> to vector<8x128x128xf32>
    %13 = vector.shape_cast %11 : vector<8x128xf32> to vector<8x128x1xf32>
    %14 = vector.broadcast %13 : vector<8x128x1xf32> to vector<8x128x128xf32>
    %15 = arith.mulf %12, %14 : vector<8x128x128xf32>
    %16 = vector.shape_cast %15 : vector<8x128x128xf32> to vector<1024x128xf32>
    %17 = tpu.iota {dimensions = array<i32: 0>} : vector<8x1024xi32>
    %18 = tpu.iota {dimensions = array<i32: 1>} : vector<8x1024xi32>
    %c128_i32 = arith.constant 128 : i32
    %19 = vector.broadcast %c128_i32 : i32 to vector<8x1024xi32>
    %20 = arith.muli %17, %19 : vector<8x1024xi32>
    %21 = arith.cmpi sge, %18, %20 : vector<8x1024xi32>
    %c128_i32_9 = arith.constant 128 : i32
    %22 = vector.broadcast %c128_i32_9 : i32 to vector<8x1024xi32>
    %23 = arith.addi %20, %22 : vector<8x1024xi32>
    %24 = arith.cmpi slt, %18, %23 : vector<8x1024xi32>
    %25 = arith.andi %21, %24 : vector<8x1024xi1>
    %cst_10 = arith.constant 1.000000e+00 : f32
    %cst_11 = arith.constant 0.000000e+00 : f32
    %26 = vector.broadcast %cst_10 : f32 to vector<8x1024xf32>
    %27 = vector.broadcast %cst_11 : f32 to vector<8x1024xf32>
    %28 = arith.select %25, %26, %27 : vector<8x1024xi1>, vector<8x1024xf32>
    %c0_12 = arith.constant 0 : index
    %c0_13 = arith.constant 0 : index
    %29 = vector.load %arg7[%c0_12, %c0_13] : memref<8x128xf32, #tpu.memory_space<vmem>>, vector<8x128xf32>
    %cst_14 = arith.constant dense<0.000000e+00> : vector<8x128xf32>
    %30 = tpu.matmul %28, %16, %cst_14 {dimension_numbers = #tpu.dot_dimension_numbers<[1], [0], [0], [1], [0, 0, 1, 1], [], []>} : vector<8x1024xf32>, vector<1024x128xf32>, vector<8x128xf32> -> vector<8x128xf32>
    %31 = arith.addf %29, %30 : vector<8x128xf32>
    %c0_15 = arith.constant 0 : index
    %c0_16 = arith.constant 0 : index
    %32 = vector.load %arg7[%c0_15, %c0_16] : memref<8x128xf32, #tpu.memory_space<vmem>>, vector<8x128xf32>
    tpu.vector_store %arg7[%c0_15, %c0_16], %31 {strides = array<i32>} : memref<8x128xf32, #tpu.memory_space<vmem>>, vector<8x128xf32>,
    %c0_17 = arith.constant 0 : index
    %c0_18 = arith.constant 0 : index
    %33 = vector.load %arg8[%c0_17, %c0_18] : memref<8x1xf32, #tpu.memory_space<vmem>>, vector<8x1xf32>
    %cst_19 = arith.constant dense<0.000000e+00> : vector<8xf32>
    %34 = vector.multi_reduction <add>, %11, %cst_19 [1] : vector<8x128xf32> to vector<8xf32>
    %35 = vector.shape_cast %34 : vector<8xf32> to vector<8x1xf32>
    %36 = arith.addf %33, %35 : vector<8x1xf32>
    %c0_20 = arith.constant 0 : index
    %c0_21 = arith.constant 0 : index
    %37 = vector.load %arg8[%c0_20, %c0_21] : memref<8x1xf32, #tpu.memory_space<vmem>>, vector<8x1xf32>
    tpu.vector_store %arg8[%c0_20, %c0_21], %36 {strides = array<i32>} : memref<8x1xf32, #tpu.memory_space<vmem>>, vector<8x1xf32>,
    %c1_i32 = arith.constant 1 : i32
    %38 = arith.cmpi eq, %arg1, %c1_i32 : i32
    %39 = arith.extui %38 : i1 to i32
    %c0_i32_22 = arith.constant 0 : i32
    %40 = arith.cmpi ne, %39, %c0_i32_22 : i32
    scf.if %40 {
      %c0_23 = arith.constant 0 : index
      %c0_24 = arith.constant 0 : index
      %41 = vector.load %arg8[%c0_23, %c0_24] : memref<8x1xf32, #tpu.memory_space<vmem>>, vector<8x1xf32>
      %cst_25 = arith.constant 9.99999971E-10 : f32
      %42 = vector.broadcast %cst_25 : f32 to vector<8x1xf32>
      %43 = arith.maximumf %41, %42 : vector<8x1xf32>
      %c0_26 = arith.constant 0 : index
      %c0_27 = arith.constant 0 : index
      %44 = vector.load %arg7[%c0_26, %c0_27] : memref<8x128xf32, #tpu.memory_space<vmem>>, vector<8x128xf32>
      %45 = tpu.reciprocal %43 {approx = true} : vector<8x1xf32> -> vector<8x1xf32>
      %46 = vector.broadcast %45 : vector<8x1xf32> to vector<8x128xf32>
      %47 = arith.mulf %44, %46 : vector<8x128xf32>
      %48 = arith.mulf %47, %47 : vector<8x128xf32>
      %cst_28 = arith.constant dense<0.000000e+00> : vector<8xf32>
      %49 = vector.multi_reduction <add>, %48, %cst_28 [1] : vector<8x128xf32> to vector<8xf32>
      %50 = vector.shape_cast %49 : vector<8xf32> to vector<8x1xf32>
      %cst_29 = arith.constant 1.000000e-24 : f32
      %51 = vector.broadcast %cst_29 : f32 to vector<8x1xf32>
      %52 = arith.maximumf %50, %51 : vector<8x1xf32>
      %53 = math.rsqrt %52 : vector<8x1xf32>
      %54 = vector.broadcast %53 : vector<8x1xf32> to vector<8x128xf32>
      %55 = arith.mulf %47, %54 : vector<8x128xf32>
      %c0_30 = arith.constant 0 : index
      %c0_31 = arith.constant 0 : index
      %56 = vector.load %arg6[%c0_30, %c0_31] : memref<8x128xf32, #tpu.memory_space<vmem>>, vector<8x128xf32>
      tpu.vector_store %arg6[%c0_30, %c0_31], %55 {strides = array<i32>} : memref<8x128xf32, #tpu.memory_space<vmem>>, vector<8x128xf32>,
    } else {
    }
    return
  }
  func.func @transform_0(%arg0: i32, %arg1: i32) -> (i32, i32, i32) {
    %c0_i32 = arith.constant 0 : i32
    %c0_i32_0 = arith.constant 0 : i32
    return %arg0, %arg1, %c0_i32 : i32, i32, i32
  }
  func.func @transform_1(%arg0: i32, %arg1: i32) -> (i32, i32) {
    %c0_i32 = arith.constant 0 : i32
    return %arg0, %arg1 : i32, i32
  }
  func.func @transform_2(%arg0: i32, %arg1: i32) -> (i32, i32) {
    %c0_i32 = arith.constant 0 : i32
    %c0_i32_0 = arith.constant 0 : i32
    %c0_i32_1 = arith.constant 0 : i32
    return %c0_i32, %c0_i32_0 : i32, i32
  }
  func.func @transform_3(%arg0: i32, %arg1: i32) -> (i32, i32) {
    %c0_i32 = arith.constant 0 : i32
    %c0_i32_0 = arith.constant 0 : i32
    %c0_i32_1 = arith.constant 0 : i32
    return %c0_i32, %c0_i32_0 : i32, i32
  }
  func.func @transform_4(%arg0: i32, %arg1: i32) -> (i32, i32) {
    %c0_i32 = arith.constant 0 : i32
    %c0_i32_0 = arith.constant 0 : i32
    return %arg0, %c0_i32 : i32, i32
  }
}

</mosaic_0001>

<bundles_post_ra>
// kernel: tpu_custom_call.1
= control target key start
LH: loop header
LB: loop body
LE: loop exit
PB: predicated region body
PF: predicated region fallthrough
CT: control target
= control target key end

     0   :  { %s5352_s0 = inlined_call_operand.hbm [shape: bf16[8,256,128], index: 0, kind: input, shape index: {}]   ;;  %s5353_s1 = inlined_call_operand.hbm [shape: f32[8,256], index: 1, kind: input, shape index: {}]   ;;  %s5354_s2 = inlined_call_operand.hbm [shape: bf16[128,128], index: 2, kind: input, shape index: {}]   ;;  %s5355_s3 = inlined_call_operand.vmem [shape: f32[1,128], index: 3, kind: input, shape index: {}]   ;;  %s5356_s4 = inlined_call_operand.hbm [shape: f32[8,128], index: 4, kind: output, shape index: {}]  }
   0x1   :  { %5381 = sst [smem:[#allocation81_spill]] %s5352_s0 }
   0x2   :  { %5382 = sst [smem:[#allocation82_spill]] %s5354_s2 }
   0x3   :  { %9 = vsyncpa [#allocation5], 0 }
   0x4   :  { %11 = vsyncpa [#allocation5 + $0x1], 0 }
   0x5   :  { %12 = vsyncpa [#allocation8], 0 }
   0x6   :  { %14 = vsyncpa [#allocation8 + $0x1], 0 }
   0x7   :  { %15 = vsyncpa [#allocation6], 0  ;;  %s3910_s15 = smov 0   ;;  %s3912_s16 = smov 0  }
   0x8   :  { %s3914_s17 = smov 0   ;;  %s3916_s18 = smov 0  }
   0x9   :  { %s3918_s19 = smov 0   ;;  %s3920_s20 = smov 0  }
   0xa LB: > { %s3939_s21 = sadd.s32 4294967295, %s3869_s20   ;;  %s30_s22 = sadd.s32 1, %s3865_s19  ;;  %s3869_s20 = sphi %s3920_s20, %s21_s20   ;;  %s3865_s19 = sphi %s3918_s19, %s5591_s19   ;;  %s3861_s18 = sphi %s3916_s18, %s5590_s18   ;;  %s3857_s17 = sphi %s3914_s17, %s5589_s17   ;;  %s3853_s16 = sphi %s3912_s16, %s5588_s16   ;;  %s3849_s15 = sphi %s3910_s15, %s5587_s15  }
   0xb   : > { %p31_p0 = scmp.ge.s32.totalorder %s30_s22, 2  ;;  %s42_s23 = sadd.s32 1, %s3857_s17 }
   0xc   : > { %p49_p1 = scmp.ne.s32.totalorder %s3857_s17, %s3853_s16  ;;  %p50_p2 = scmp.eq.s32.totalorder %s3869_s20, 0 }
   0xd   : > { %s5593_s22 = smov (%p31_p0, %s30_s22), 0  ;;  %p55_p4 = scmp.ne.s32.totalorder %s3853_s16, %s3849_s15 }
   0xe   : > { %p3948_p3 = por %p50_p2, %p49_p1  ;;  %s38_s25 = ssub.s32 %s3865_s19, %s5593_s22 }
   0xf   : > { %p5357_p5 = scmp.eq.s32.totalorder %s3939_s21, 0  ;;  %p40_p6 = scmp.eq.s32.totalorder %s38_s25, 0 }
  0x10   : > { %s5383_s24 = scalar_select %p3948_p3, 1, 0 }
  0x11   : > { %p2700_p7 = scmp.ge.s32.totalorder %s3869_s20, 1  ;;  %p3959_p8 = por %p5357_p5, %p55_p4 }
  0x12   : > { %p162_p9 = scmp.lt.s32.totalorder %s3869_s20, 3  ;;  %s3871_s29 = smov [#allocation9]  }
  0x13   : > { %s5384_s26 = scalar_select %p3959_p8, 1, 0 }
  0x14   : > { %s3965_s27 = scalar_select %p40_p6, %s3857_s17, %s42_s23  }
  0x15   : > { %p3967_p10 = pnand %p2700_p7, %p162_p9  ;;  %s174_s30 = sshll.u32 %s3871_s29, 4  ;;  %s175_s30 = int_to_ptr.vmem [resolvable:$true] %s174_s30 }
  0x16   : > { %s5387_s2 = sld [smem:[#allocation82_spill]] }
  0x17   : > { %s5385_s28 = scalar_select %p3967_p10, 1, 0 }
  0x18   : > { %p3321_p11 = pneg %p3967_p10 }
  0x1a   : > { %p3975_p12 = pnand %p3321_p11, %p5357_p5 }
  0x1c   : > { %s3725_s8 = scalar_lea.hbm %s5387_s2, 1024  ;;  %p3727_p0 = pneg %p3975_p12 }
  0x1d   : > { %p3726_p13 = scmp.ne.s32.totalorder %s5387_s2, %s3725_s8  ;;  %p3732_p4 = scmp.lt.u32.totalorder %s3725_s8, %s5387_s2 }
  0x1f   : > { %p3728_p1 = pnand %p3727_p0, %p3726_p13 }
  0x21   : > { %p3729_p2 = pneg %p3728_p1 }
  0x23   : > { %p3734_p6 = pnand %p3732_p4, %p3729_p2 }
  0x25   : > { %3737 = shalt.err (!%p3734_p6)
}
  0x26   : > { %s3738_s13 = scalar_lea.vmem %s175_s30, 1024  ;;  %p3746_p5 = scmp.lt.s32.totalorder %s175_s30, %s175_s30 }
  0x27   : > { %p3739_p7 = scmp.ne.s32.totalorder %s175_s30, %s3738_s13  ;;  %p3747_p8 = scmp.lt.s32.totalorder %s3738_s13, %s3738_s13 }
  0x29   : > { %p3741_p9 = pnand %p3739_p7, %p3727_p0  ;;  %p3748_p10 = por %p3747_p8, %p3746_p5 }
  0x2b   : > { %p3742_p11 = pneg %p3741_p9 }
  0x2d   : > { %p3749_p3 = pnand %p3748_p10, %p3742_p11 }
  0x2f   : > { %3752 = shalt.err (!%p3749_p3)
}
  0x30   : > { %s3872_s14 = smov 64   ;;  %s3873_s15 = smov 4  }
  0x31   : > { %3324 = dma.hbm_to_vmem [thread:$0]  (!%p3975_p12), %s5387_s2, 1024, %s175_s30, [#allocation8], %s3872_s14, %s3872_s14, %s3873_s15  }
  0x32   : > { %p2702_p13 = scmp.ge.s32.totalorder %s3869_s20, 2 }
  0x34   : > { %187 = sbr.rel (%p2702_p13) target bundleno = 98 (0x62), region = 24 }
  0x3b   : > { %s191_s29 = sand.u32 1, %s3857_s17   ;;  %s2801_s6 = sshll.u32 %s3865_s19, 10 }
  0x3c   : > { %s2703_s7 = sshll.u32 %s191_s29, 9  ;;  %s5388_s0 = sld [smem:[#allocation81_spill]] }
  0x3d   : > { %p5389_p3 = scmp.ne.s32.totalorder %s5383_s24, 0  ;;  %s195_s10 = scalar_lea.vmem [#allocation4], %s2703_s7 }
  0x3e   : > { %s217_s11 = sshll.u32 %s195_s10, 4  ;;  %s3874_s13 = smov 2048   ;;  %s218_s11 = int_to_ptr.vmem [resolvable:$true] %s217_s11 }
  0x3f   : > { %s3304_s30 = scalar_select %p5389_p3, [#allocation0], [#allocation13] }
  0x40   : > { %3305 = sst [smem:[#allocation12]] (%p5389_p3), %s3874_s13  ;;  %s3875_s14 = smov 1024  }
  0x41   : > { %s209_s12 = sld [smem:[%s3304_s30]]   ;;  %s3876_s15 = smov 16  }
  0x42   : > { %s204_s9 = scalar_lea.hbm %s5388_s0, %s2801_s6  ;;  %3306 = sst [smem:[#allocation12 + $0x1]] (%p5389_p3), %s3875_s14 }
  0x43   : > { %3307 = sst [smem:[#allocation12 + $0x2]] (%p5389_p3), %s3876_s15  ;;  %s3877_s23 = smov 64  }
  0x44   : > { %3308 = sst [smem:[#allocation12 + $0x3]] (%p5389_p3), %s3877_s23  ;;  %s3878_s6 = smov 4  }
  0x45   : > { %3309 = sst [smem:[#allocation12 + $0x4]] (%p5389_p3), %s3877_s23  ;;  %s192_s8 = scalar_lea.sflag [#allocation5], %s191_s29 }
  0x46   : > { %3310 = sst [smem:[#allocation12 + $0x5]] (%p5389_p3), %s3878_s6  ;;  %s3879_s5 = smov [#allocation11]  }
  0x47   : > { %s2706_s25 = sshll.u32 %s209_s12, 26  ;;  %s240_s30 = sand.u32 1, %s3869_s20  }
  0x48   : > { %s2707_s7 = sadd.s32 134217728, %s2706_s25  ;;  %s2708_s10 = sshll.u32 %s191_s29, 3 }
  0x49   : > { %3311 = dma.general (%p5389_p3), %s204_s9, 8192, %s218_s11, %s192_s8, %s3879_s5, [#allocation12], %s2707_s7, 0  }
  0x4a   : > { %s2709_s13 = sshll.u32 %s3865_s19, 7  ;;  %s244_s14 = scalar_lea.vmem [#allocation7], %s2708_s10 }
  0x4b   : > { %s253_s15 = sshll.u32 %s244_s14, 4  ;;  %s4022_s12 = scalar_lea.hbm %s5353_s1, %s2709_s13  ;;  %s254_s15 = int_to_ptr.vmem [resolvable:$true] %s253_s15 }
  0x4c   : > { %s241_s23 = scalar_lea.sflag [#allocation8], %s240_s30  ;;  %s3753_s9 = scalar_lea.hbm %s4022_s12, 128 }
  0x4d   : > { %p3754_p5 = scmp.ne.s32.totalorder %s4022_s12, %s3753_s9  ;;  %s3757_s25 = scalar_lea.hbm %s5353_s1, 256 }
  0x4e   : > { %p3758_p12 = scmp.lt.u32.totalorder %s4022_s12, %s5353_s1  ;;  %p3759_p0 = scmp.lt.u32.totalorder %s3757_s25, %s3753_s9 }
  0x4f   : > { %p3755_p8 = pnand %p3754_p5, %p5389_p3  ;;  %p3761_p2 = scmp.lt.u32.totalorder %s3753_s9, %s4022_s12 }
  0x50   : > { %p3760_p1 = por %p3759_p0, %p3758_p12 }
  0x51   : > { %p3756_p10 = pneg %p3755_p8 }
  0x52   : > { %p3762_p4 = por %p3761_p2, %p3760_p1 }
  0x54   : > { %p3763_p6 = pnand %p3762_p4, %p3756_p10 }
  0x56   : > { %3766 = shalt.err (!%p3763_p6)
}
  0x57   : > { %s3767_s0 = scalar_lea.vmem %s254_s15, 128  ;;  %s3880_s2 = smov [#allocation7]  }
  0x58   : > { %p3768_p7 = scmp.ne.s32.totalorder %s254_s15, %s3767_s0  ;;  %s3771_s8 = sshll.u32 %s3880_s2, 4  ;;  %s3772_s8 = int_to_ptr.vmem [resolvable:$false] %s3771_s8 }
  0x59   : > { %s3773_s5 = scalar_lea.vmem %s3772_s8, 256  ;;  %p3774_p13 = scmp.lt.s32.totalorder %s254_s15, %s3772_s8 }
  0x5a   : > { %p3769_p9 = pnand %p3768_p7, %p5389_p3  ;;  %p3775_p5 = scmp.lt.s32.totalorder %s3773_s5, %s3767_s0 }
  0x5c   : > { %p3770_p11 = pneg %p3769_p9  ;;  %p3776_p8 = por %p3775_p5, %p3774_p13 }
  0x5e   : > { %p3777_p0 = pnand %p3776_p8, %p3770_p11 }
  0x60   : > { %3780 = shalt.err (!%p3777_p0)
}
  0x61   : > { %3312 = dma.hbm_to_vmem [thread:$0]  (%p5389_p3), %s4022_s12, 128, %s254_s15, %s241_s23  }
  0x62 PF: > { %p5390_p10 = scmp.ne.s32.totalorder %s5385_s28, 0 }
  0x64   : > { %262 = sbr.rel (%p5390_p10) target bundleno = 1032 (0x408), region = 36 }
  0x6b   : > { %s264_s30 = sand.u32 1, %s3853_s16   ;;  %p5391_p12 = scmp.ne.s32.totalorder %s5384_s26, 0 }
  0x6c   : > { %s2711_s10 = sshll.u32 %s264_s30, 9  ;;  %s265_s13 = scalar_lea.sflag [#allocation5], %s264_s30 }
  0x6d   : > { %s4044_s14 = scalar_lea.vmem [#allocation4], %s2711_s10 }
  0x6e   : > { %3832 = dma.done.wait (%p5391_p12), %s265_s13, 8192  }
  0x6f   : > { %3834 = vsyncadd (%p5391_p12), %s265_s13, 4294959104  ;;  %s273_s24 = sand.u32 1, %s3939_s21   ;;  %s2712_s15 = sshll.u32 %s264_s30, 3 }
  0x70   : > { %s274_s12 = scalar_lea.sflag [#allocation8], %s273_s24  ;;  %s4051_s23 = scalar_lea.vmem [#allocation7], %s2712_s15 }
  0x71   : > { %3836 = dma.done.wait (%p5391_p12), %s274_s12, 128  }
  0x72   : > { %3838 = vsyncadd (%p5391_p12), %s274_s12, 4294967168  ;;  %p5392_p3 = scmp.eq.s32.totalorder %s3939_s21, 0 }
  0x74   : > { %3840 = dma.done.wait (%p5392_p3), [#allocation8], 1024   ;;  %p5393_p1 = pmov %p5392_p3 }
  0x75   : > { %p2714_p2 = scmp.ne.s32.totalorder %s3861_s18, 0 }
  0x76   : > { %3842 = vsyncadd (%p5393_p1), [#allocation8], 4294966272  ;;  %vm314_vm0 = vcmask (!%p2714_p2), 7168   ;;  %v3881_v0 = vmov (!%p2714_p2), 0.0  }
  0x77   : > { %312 = sbr.rel (%p2714_p2) target bundleno = 126 (0x7e), region = 52  ;;  %313 = vst [vmem:[#allocation2] sm:$0xff] (!%p2714_p2), %v3881_v0  ;;  %315 = vst.msk [vmem:[#allocation3] sm:$0xff] (!%p2714_p2), %vm314_vm0, %v3881_v0 }
  0x7e PF: > { %v3390_v1 = vld [vmem:[#allocation9] sm:$0xff]   ;;  %v3391_v2 = vld [vmem:[#allocation9 + $0x8] sm:$0xff]   ;;  %v3392_v3 = vld [vmem:[#allocation9 + $0x10] sm:$0xff]   ;;  %v1573_v6 = vlaneseq  ;;  %p2796_p4 = scmp.ne.s32.totalorder %s3861_s18, 1 }
  0x7f   : > { %3014 = vmatprep.subr.bf16.mxu0 %v3390_v1  ;;  %3286 = vmatprep.subr.bf16.mxu1 %v3390_v1  ;;  %v3393_v4 = vld [vmem:[#allocation9 + $0x18] sm:$0xff]   ;;  %v3398_v5 = vld [vmem:[%s4044_s14] sm:$0xff]   ;;  %v3394_v7 = vld [vmem:[#allocation9 + $0x20] sm:$0xff]  }
  0x80   : > { %3015 = vmatpush3.bf16.msra.mxu0 %v3390_v1  ;;  %3294 = vmatpush3.bf16.msra.mxu1 %v3390_v1  ;;  %v4064_v8 = vshrl.u32 %v1573_v6, 7  ;;  %v3395_v9 = vld [vmem:[#allocation9 + $0x28] sm:$0xff]   ;;  %v3396_v12 = vld [vmem:[#allocation9 + $0x30] sm:$0xff]   ;;  %v3397_v16 = vld [vmem:[#allocation9 + $0x38] sm:$0xff]  }
  0x81   : > { %3016 = vmatprep.subr.bf16.mxu0 %v3391_v2  ;;  %3287 = vmatprep.subr.bf16.mxu1 %v3391_v2  ;;  %v4069_v13 = vld [vmem:[%s4051_s23] sm:$0xff]  ;;  %v3400_v18 = vld [vmem:[%s4044_s14 + $0x10] sm:$0xff]   ;;  %v3401_v19 = vld [vmem:[%s4044_s14 + $0x18] sm:$0xff]  }
  0x82   : > { %3030 = vmatprep.mubr.bf16.mxu0 %v3398_v5  ;;  %v1642_v10 = vsub.s32 1, %v4064_v8  ;;  %v1575_v11 = vsub.s32 0, %v4064_v8  ;;  %v3399_v17 = vld [vmem:[%s4044_s14 + $0x8] sm:$0xff]   ;;  %v3402_v20 = vld [vmem:[%s4044_s14 + $0x20] sm:$0xff]   ;;  %v3430_v21 = vld [vmem:[%s4044_s14 + $0x170] sm:$0xff]   ;;  %v1776_v42 = vsub.s32 3, %v4064_v8 }
  0x83   : > { %v3431_v22 = vld [vmem:[%s4044_s14 + $0x178] sm:$0xff]   ;;  %3122 = vmatprep.mubr.bf16.mxu1 %v3430_v21  ;;  %v3434_v23 = vld [vmem:[%s4044_s14 + $0x180] sm:$0xff]   ;;  %v3403_v24 = vld [vmem:[%s4044_s14 + $0x28] sm:$0xff]   ;;  %v1709_v46 = vsub.s32 2, %v4064_v8 }
  0x84   : > { %3017 = vmatpush3.bf16.msra.mxu0 %v3391_v2  ;;  %3295 = vmatpush3.bf16.msra.mxu1 %v3391_v2  ;;  %v4072_v14 = vrot.slane %v4069_v13, %v1642_v10  ;;  %v4075_v15 = vrot.slane %v4069_v13, %v1575_v11  ;;  %v3404_v25 = vld [vmem:[%s4044_s14 + $0x30] sm:$0xff]   ;;  %v3435_v26 = vld [vmem:[%s4044_s14 + $0x188] sm:$0xff]   ;;  %v3405_v28 = vld [vmem:[%s4044_s14 + $0x38] sm:$0xff]   ;;  %v4137_v45 = vrot.slane %v4069_v13, %v1776_v42  ;;  %v1910_v11 = vsub.s32 5, %v4064_v8 }
  0x85   : > { %3018 = vmatprep.subr.bf16.mxu0 %v3392_v3  ;;  %3288 = vmatprep.subr.bf16.mxu1 %v3392_v3  ;;  %v3438_v27 = vld [vmem:[%s4044_s14 + $0x190] sm:$0xff]   ;;  %v3406_v29 = vld [vmem:[%s4044_s14 + $0x40] sm:$0xff]   ;;  %v3439_v30 = vld [vmem:[%s4044_s14 + $0x198] sm:$0xff]   ;;  %v4145_v49 = vrot.slane %v4069_v13, %v1709_v46 }
  0x86   : > { %1645 = vbcast.lane.b32.xlu0 %v4072_v14, 256  ;;  %1578 = vbcast.lane.b32.xlu1 %v4075_v15, 256  ;;  %v3442_v31 = vld [vmem:[%s4044_s14 + $0x1a0] sm:$0xff]   ;;  %v3407_v32 = vld [vmem:[%s4044_s14 + $0x48] sm:$0xff]   ;;  %v3408_v33 = vld [vmem:[%s4044_s14 + $0x50] sm:$0xff]  }
  0x87   : > { %v3443_v34 = vld [vmem:[%s4044_s14 + $0x1a8] sm:$0xff]   ;;  %v3446_v35 = vld [vmem:[%s4044_s14 + $0x1b0] sm:$0xff]   ;;  %v3409_v36 = vld [vmem:[%s4044_s14 + $0x58] sm:$0xff]  }
  0x88   : > { %3019 = vmatpush3.bf16.msra.mxu0 %v3392_v3  ;;  %3296 = vmatpush3.bf16.msra.mxu1 %v3392_v3  ;;  %v3410_v37 = vld [vmem:[%s4044_s14 + $0x60] sm:$0xff]   ;;  %v3447_v38 = vld [vmem:[%s4044_s14 + $0x1b8] sm:$0xff]   ;;  %v3411_v40 = vld [vmem:[%s4044_s14 + $0x68] sm:$0xff]  }
  0x89   : > { %3020 = vmatprep.subr.bf16.mxu0 %v3393_v4  ;;  %3289 = vmatprep.subr.bf16.mxu1 %v3393_v4  ;;  %v3450_v39 = vld [vmem:[%s4044_s14 + $0x1c0] sm:$0xff]   ;;  %v3412_v41 = vld [vmem:[%s4044_s14 + $0x70] sm:$0xff]   ;;  %v3451_v43 = vld [vmem:[%s4044_s14 + $0x1c8] sm:$0xff]  }
  0x8a   : > { %1649 = vbcast.lane.b32.xlu0 %v4072_v14, 264  ;;  %1582 = vbcast.lane.b32.xlu1 %v4075_v15, 264  ;;  %v3456_v44 = vld [vmem:[%s4044_s14 + $0x1d0] sm:$0xff]   ;;  %v3413_v47 = vld [vmem:[%s4044_s14 + $0x78] sm:$0xff]   ;;  %v3414_v48 = vld [vmem:[%s4044_s14 + $0x80] sm:$0xff]  }
  0x8b   : > { %v3457_v50 = vld [vmem:[%s4044_s14 + $0x1d8] sm:$0xff]   ;;  %v3458_v51 = vld [vmem:[%s4044_s14 + $0x1e0] sm:$0xff]   ;;  %v3415_v52 = vld [vmem:[%s4044_s14 + $0x88] sm:$0xff]  }
  0x8c   : > { %3021 = vmatpush3.bf16.msra.mxu0 %v3393_v4  ;;  %3297 = vmatpush3.bf16.msra.mxu1 %v3393_v4  ;;  %v3416_v53 = vld [vmem:[%s4044_s14 + $0x90] sm:$0xff]   ;;  %v3459_v54 = vld [vmem:[%s4044_s14 + $0x1e8] sm:$0xff]   ;;  %v3417_v56 = vld [vmem:[%s4044_s14 + $0x98] sm:$0xff]  }
  0x8d   : > { %3022 = vmatprep.subr.bf16.mxu0 %v3394_v7  ;;  %3290 = vmatprep.subr.bf16.mxu1 %v3394_v7  ;;  %v3460_v55 = vld [vmem:[%s4044_s14 + $0x1f0] sm:$0xff]   ;;  %v3418_v57 = vld [vmem:[%s4044_s14 + $0xa0] sm:$0xff]   ;;  %v3461_v58 = vld [vmem:[%s4044_s14 + $0x1f8] sm:$0xff]  }
  0x8e   : > { %1653 = vbcast.lane.b32.xlu0 %v4072_v14, 272  ;;  %1657 = vbcast.lane.b32.xlu1 %v4072_v14, 280  ;;  %v3419_v59 = vld [vmem:[%s4044_s14 + $0xa8] sm:$0xff]   ;;  %v3420_v60 = vld [vmem:[%s4044_s14 + $0xb0] sm:$0xff]   ;;  %v3421_v61 = vld [vmem:[%s4044_s14 + $0xb8] sm:$0xff]  }
  0x8f   : > { %v3422_v62 = vld [vmem:[%s4044_s14 + $0xc0] sm:$0xff]   ;;  %v3423_v63 = vld [vmem:[%s4044_s14 + $0xc8] sm:$0xff]   ;;  %v3424_v0 = vld [vmem:[%s4044_s14 + $0xd0] sm:$0xff]  }
  0x90   : > { %3023 = vmatpush3.bf16.msra.mxu0 %v3394_v7  ;;  %3298 = vmatpush3.bf16.msra.mxu1 %v3394_v7  ;;  %v3425_v1 = vld [vmem:[%s4044_s14 + $0xd8] sm:$0xff]   ;;  %v3426_v2 = vld [vmem:[%s4044_s14 + $0xe0] sm:$0xff]   ;;  %v3427_v7 = vld [vmem:[%s4044_s14 + $0xe8] sm:$0xff]  }
  0x91   : > { %3024 = vmatprep.subr.bf16.mxu0 %v3395_v9  ;;  %3291 = vmatprep.subr.bf16.mxu1 %v3395_v9  ;;  %v3428_v10 = vld [vmem:[%s4044_s14 + $0xf0] sm:$0xff]  }
  0x92   : > { %1586 = vbcast.lane.b32.xlu0 %v4075_v15, 272  ;;  %1590 = vbcast.lane.b32.xlu1 %v4075_v15, 280 }
  0x94   : > { %3025 = vmatpush3.bf16.msra.mxu0 %v3395_v9  ;;  %3299 = vmatpush3.bf16.msra.mxu1 %v3395_v9 }
  0x95   : > { %3026 = vmatprep.subr.bf16.mxu0 %v3396_v12  ;;  %3292 = vmatprep.subr.bf16.mxu1 %v3396_v12 }
  0x96   : > { %1661 = vbcast.lane.b32.xlu0 %v4072_v14, 288  ;;  %1665 = vbcast.lane.b32.xlu1 %v4072_v14, 296 }
  0x98   : > { %3027 = vmatpush3.bf16.msra.mxu0 %v3396_v12  ;;  %3300 = vmatpush3.bf16.msra.mxu1 %v3396_v12 }
  0x99   : > { %3028 = vmatprep.subr.bf16.mxu0 %v3397_v16  ;;  %3293 = vmatprep.subr.bf16.mxu1 %v3397_v16 }
  0x9a   : > { %1594 = vbcast.lane.b32.xlu0 %v4075_v15, 288  ;;  %1598 = vbcast.lane.b32.xlu1 %v4075_v15, 296 }
  0x9c   : > { %3029 = vmatpush3.bf16.msra.mxu0 %v3397_v16  ;;  %3301 = vmatpush3.bf16.msra.mxu1 %v3397_v16  ;;  %v1843_v16 = vsub.s32 4, %v4064_v8 }
  0x9e   : > { %1669 = vbcast.lane.b32.xlu0 %v4072_v14, 304  ;;  %1673 = vbcast.lane.b32.xlu1 %v4072_v14, 312  ;;  %v4222_v21 = vrot.slane %v4069_v13, %v1843_v16 }
  0x9f   : > { %3031 = vmatmul.mubr.bf16.vlgmr.msra.gmra.mrb[0].mxu0 %v3399_v17  ;;  %3123 = vmatmul.mubr.bf16.vlgmr.msra.gmra.mrb[0].mxu1 %v3431_v22 }
  0xa0   : > { %3034 = vmatprep.mubr.bf16.mxu0 %v3400_v18  ;;  %3126 = vmatprep.mubr.bf16.mxu1 %v3434_v23  ;;  %v3429_v18 = vld [vmem:[%s4044_s14 + $0xf8] sm:$0xff]  }
  0xa2   : > { %1602 = vbcast.lane.b32.xlu0 %v4075_v15, 304  ;;  %1606 = vbcast.lane.b32.xlu1 %v4075_v15, 312 }
  0xa6   : > { %1677 = vbcast.lane.b32.xlu0 %v4072_v14, 320  ;;  %1681 = vbcast.lane.b32.xlu1 %v4072_v14, 328 }
  0xa7   : > { %3035 = vmatmul.mubr.bf16.gmra.mrb[4].mxu0 %v3401_v19  ;;  %3127 = vmatmul.mubr.bf16.gmra.mrb[4].mxu1 %v3435_v26 }
  0xa8   : > { %3038 = vmatprep.mubr.bf16.mxu0 %v3402_v20  ;;  %3130 = vmatprep.mubr.bf16.mxu1 %v3438_v27  ;;  %v3432_v20 = vld [vmem:[%s4044_s14 + $0x100] sm:$0xff]   ;;  %v3436_v27 = vld [vmem:[%s4044_s14 + $0x110] sm:$0xff]  }
  0xaa   : > { %1610 = vbcast.lane.b32.xlu0 %v4075_v15, 320  ;;  %1614 = vbcast.lane.b32.xlu1 %v4075_v15, 328 }
  0xae   : > { %1685 = vbcast.lane.b32.xlu0 %v4072_v14, 336  ;;  %1689 = vbcast.lane.b32.xlu1 %v4072_v14, 344 }
  0xaf   : > { %3039 = vmatmul.mubr.bf16.gmra.mrb[8].mxu0 %v3403_v24  ;;  %3131 = vmatmul.mubr.bf16.gmra.mrb[8].mxu1 %v3439_v30 }
  0xb0   : > { %3042 = vmatprep.mubr.bf16.mxu0 %v3404_v25  ;;  %3134 = vmatprep.mubr.bf16.mxu1 %v3442_v31  ;;  %v3433_v25 = vld [vmem:[%s4044_s14 + $0x108] sm:$0xff]   ;;  %v3437_v31 = vld [vmem:[%s4044_s14 + $0x118] sm:$0xff]  }
  0xb2   : > { %1618 = vbcast.lane.b32.xlu0 %v4075_v15, 336  ;;  %1622 = vbcast.lane.b32.xlu1 %v4075_v15, 344 }
  0xb6   : > { %1693 = vbcast.lane.b32.xlu0 %v4072_v14, 352  ;;  %1697 = vbcast.lane.b32.xlu1 %v4072_v14, 360 }
  0xb7   : > { %3043 = vmatmul.mubr.bf16.gmra.mrb[12].mxu0 %v3405_v28  ;;  %3135 = vmatmul.mubr.bf16.gmra.mrb[12].mxu1 %v3443_v34 }
  0xb8   : > { %3046 = vmatprep.mubr.bf16.mxu0 %v3406_v29  ;;  %3138 = vmatprep.mubr.bf16.mxu1 %v3446_v35 }
  0xba   : > { %1626 = vbcast.lane.b32.xlu0 %v4075_v15, 352  ;;  %1630 = vbcast.lane.b32.xlu1 %v4075_v15, 360 }
  0xbe   : > { %1701 = vbcast.lane.b32.xlu0 %v4072_v14, 368  ;;  %1705 = vbcast.lane.b32.xlu1 %v4072_v14, 376 }
  0xbf   : > { %3047 = vmatmul.mubr.bf16.gmra.mrb[16].mxu0 %v3407_v32  ;;  %3139 = vmatmul.mubr.bf16.gmra.mrb[16].mxu1 %v3447_v38 }
  0xc0   : > { %3050 = vmatprep.mubr.bf16.mxu0 %v3408_v33  ;;  %3142 = vmatprep.mubr.bf16.mxu1 %v3450_v39  ;;  %v3440_v33 = vld [vmem:[%s4044_s14 + $0x120] sm:$0xff]   ;;  %v3444_v39 = vld [vmem:[%s4044_s14 + $0x130] sm:$0xff]  }
  0xc2   : > { %1634 = vbcast.lane.b32.xlu0 %v4075_v15, 368  ;;  %1638 = vbcast.lane.b32.xlu1 %v4075_v15, 376  ;;  %v4210_v15 = vrot.slane %v4069_v13, %v1910_v11 }
  0xc6   : > { %1779 = vbcast.lane.b32.xlu0 %v4137_v45, 256  ;;  %1783 = vbcast.lane.b32.xlu1 %v4137_v45, 264 }
  0xc7   : > { %3051 = vmatmul.mubr.bf16.gmra.mrb[20].mxu0 %v3409_v36  ;;  %3143 = vmatmul.mubr.bf16.gmra.mrb[20].mxu1 %v3451_v43  ;;  %v3445_v43 = vld [vmem:[%s4044_s14 + $0x138] sm:$0xff]  }
  0xc8   : > { %3054 = vmatprep.mubr.bf16.mxu0 %v3410_v37  ;;  %3146 = vmatprep.mubr.bf16.mxu1 %v3456_v44  ;;  %v3441_v37 = vld [vmem:[%s4044_s14 + $0x128] sm:$0xff]  }
  0xca   : > { %1712 = vbcast.lane.b32.xlu0 %v4145_v49, 256  ;;  %1716 = vbcast.lane.b32.xlu1 %v4145_v49, 264 }
  0xce   : > { %1787 = vbcast.lane.b32.xlu0 %v4137_v45, 272  ;;  %1791 = vbcast.lane.b32.xlu1 %v4137_v45, 280 }
  0xcf   : > { %3055 = vmatmul.mubr.bf16.gmra.mrb[24].mxu0 %v3411_v40  ;;  %3147 = vmatmul.mubr.bf16.gmra.mrb[24].mxu1 %v3457_v50 }
  0xd0   : > { %3058 = vmatprep.mubr.bf16.mxu0 %v3412_v41  ;;  %3150 = vmatprep.mubr.bf16.mxu1 %v3458_v51  ;;  %v3452_v51 = vld [vmem:[%s4044_s14 + $0x150] sm:$0xff]  }
  0xd2   : > { %1720 = vbcast.lane.b32.xlu0 %v4145_v49, 272  ;;  %1724 = vbcast.lane.b32.xlu1 %v4145_v49, 280 }
  0xd6   : > { %1795 = vbcast.lane.b32.xlu0 %v4137_v45, 288  ;;  %1799 = vbcast.lane.b32.xlu1 %v4137_v45, 296 }
  0xd7   : > { %3059 = vmatmul.mubr.bf16.gmra.mrb[28].mxu0 %v3413_v47  ;;  %3151 = vmatmul.mubr.bf16.gmra.mrb[28].mxu1 %v3459_v54 }
  0xd8   : > { %3062 = vmatprep.mubr.bf16.mxu0 %v3414_v48  ;;  %3154 = vmatprep.mubr.bf16.mxu1 %v3460_v55  ;;  %v3453_v55 = vld [vmem:[%s4044_s14 + $0x158] sm:$0xff]  }
  0xda   : > { %1728 = vbcast.lane.b32.xlu0 %v4145_v49, 288  ;;  %1732 = vbcast.lane.b32.xlu1 %v4145_v49, 296 }
  0xde   : > { %1803 = vbcast.lane.b32.xlu0 %v4137_v45, 304  ;;  %1807 = vbcast.lane.b32.xlu1 %v4137_v45, 312 }
  0xdf   : > { %3063 = vmatmul.mubr.bf16.gmra.mrb[32].mxu0 %v3415_v52  ;;  %3155 = vmatmul.mubr.bf16.gmra.mrb[32].mxu1 %v3461_v58 }
  0xe0   : > { %3066 = vmatprep.mubr.bf16.mxu0 %v3416_v53 }
  0xe2   : > { %1736 = vbcast.lane.b32.xlu0 %v4145_v49, 304  ;;  %1740 = vbcast.lane.b32.xlu1 %v4145_v49, 312 }
  0xe6   : > { %1811 = vbcast.lane.b32.xlu0 %v4137_v45, 320  ;;  %1815 = vbcast.lane.b32.xlu1 %v4137_v45, 328 }
  0xe7   : > { %3067 = vmatmul.mubr.bf16.gmra.mrb[36].mxu0 %v3417_v56 }
  0xe8   : > { %3070 = vmatprep.mubr.bf16.mxu0 %v3418_v57  ;;  %v3454_v57 = vld [vmem:[%s4044_s14 + $0x160] sm:$0xff]  }
  0xea   : > { %1744 = vbcast.lane.b32.xlu0 %v4145_v49, 320  ;;  %1748 = vbcast.lane.b32.xlu1 %v4145_v49, 328 }
  0xee   : > { %1819 = vbcast.lane.b32.xlu0 %v4137_v45, 336  ;;  %1823 = vbcast.lane.b32.xlu1 %v4137_v45, 344 }
  0xef   : > { %3071 = vmatmul.mubr.bf16.gmra.mrb[40].mxu0 %v3419_v59 }
  0xf0   : > { %3074 = vmatprep.mubr.bf16.mxu0 %v3420_v60 }
  0xf2   : > { %1752 = vbcast.lane.b32.xlu0 %v4145_v49, 336  ;;  %1756 = vbcast.lane.b32.xlu1 %v4145_v49, 344 }
  0xf6   : > { %1827 = vbcast.lane.b32.xlu0 %v4137_v45, 352  ;;  %1831 = vbcast.lane.b32.xlu1 %v4137_v45, 360 }
  0xf7   : > { %3075 = vmatmul.mubr.bf16.gmra.mrb[44].mxu0 %v3421_v61  ;;  %v3455_v61 = vld [vmem:[%s4044_s14 + $0x168] sm:$0xff]  }
  0xf8   : > { %3078 = vmatprep.mubr.bf16.mxu0 %v3422_v62  ;;  %v4189_v3 = vpop.permute.xlu0 %1645  ;;  %v4191_v4 = vpop.permute.xlu1 %1578 }
  0xfa   : > { %1760 = vbcast.lane.b32.xlu0 %v4145_v49, 352  ;;  %1764 = vbcast.lane.b32.xlu1 %v4145_v49, 360 }
  0xfc   : > { %v4195_v5 = vpop.permute.xlu0 %1649  ;;  %v4198_v9 = vpop.permute.xlu1 %1582 }
  0xfe   : > { %1835 = vbcast.lane.b32.xlu0 %v4137_v45, 368  ;;  %1839 = vbcast.lane.b32.xlu1 %v4137_v45, 376  ;;  %v3448_v45 = vld [vmem:[%s4044_s14 + $0x140] sm:$0xff]  }
  0xff   : > { %3079 = vmatmul.mubr.bf16.gmra.mrb[48].mxu0 %v3423_v63  ;;  %v2044_v63 = vsub.s32 7, %v4064_v8 }
 0x100   : > { %3082 = vmatprep.mubr.bf16.mxu0 %v3424_v0  ;;  %v4204_v12 = vpop.permute.xlu0 %1653  ;;  %v4206_v14 = vpop.permute.xlu1 %1657 }
 0x102   : > { %1768 = vbcast.lane.b32.xlu0 %v4145_v49, 368  ;;  %1772 = vbcast.lane.b32.xlu1 %v4145_v49, 376  ;;  %v3449_v49 = vld [vmem:[%s4044_s14 + $0x148] sm:$0xff]  }
 0x104   : > { %v4214_v17 = vpop.permute.xlu0 %1586  ;;  %v4217_v19 = vpop.permute.xlu1 %1590 }
 0x106   : > { %1913 = vbcast.lane.b32.xlu0 %v4210_v15, 256  ;;  %1917 = vbcast.lane.b32.xlu1 %v4210_v15, 264 }
 0x107   : > { %3083 = vmatmul.mubr.bf16.gmra.mrb[52].mxu0 %v3425_v1 }
 0x108   : > { %3086 = vmatprep.mubr.bf16.mxu0 %v3426_v2  ;;  %v4225_v22 = vpop.permute.xlu0 %1661  ;;  %v4227_v23 = vpop.permute.xlu1 %1665  ;;  %v4329_v2 = vrot.slane %v4069_v13, %v2044_v63 }
 0x10a   : > { %1846 = vbcast.lane.b32.xlu0 %v4222_v21, 256  ;;  %1850 = vbcast.lane.b32.xlu1 %v4222_v21, 264 }
 0x10c   : > { %v4231_v24 = vpop.permute.xlu0 %1594  ;;  %v4234_v26 = vpop.permute.xlu1 %1598 }
 0x10e   : > { %1921 = vbcast.lane.b32.xlu0 %v4210_v15, 272  ;;  %1925 = vbcast.lane.b32.xlu1 %v4210_v15, 280 }
 0x10f   : > { %3087 = vmatmul.mubr.bf16.gmra.mrb[56].mxu0 %v3427_v7  ;;  %v1977_v7 = vsub.s32 6, %v4064_v8 }
 0x110   : > { %3090 = vmatprep.mubr.bf16.mxu0 %v3428_v10  ;;  %v4239_v28 = vpop.permute.xlu0 %1669  ;;  %v4241_v29 = vpop.permute.xlu1 %1673 }
 0x112   : > { %1854 = vbcast.lane.b32.xlu0 %v4222_v21, 272  ;;  %1858 = vbcast.lane.b32.xlu1 %v4222_v21, 280 }
 0x114   : > { %v4245_v30 = vpop.permute.xlu0 %1602  ;;  %v4248_v32 = vpop.permute.xlu1 %1606 }
 0x116   : > { %1929 = vbcast.lane.b32.xlu0 %v4210_v15, 288  ;;  %1933 = vbcast.lane.b32.xlu1 %v4210_v15, 296 }
 0x117   : > { %3091 = vmatmul.mubr.bf16.gmra.mrb[60].mxu0 %v3429_v18 }
 0x118   : > { %3094 = vmatprep.mubr.bf16.mxu0 %v3432_v20  ;;  %v4253_v34 = vpop.permute.xlu0 %1677  ;;  %v4255_v35 = vpop.permute.xlu1 %1681 }
 0x11a   : > { %1862 = vbcast.lane.b32.xlu0 %v4222_v21, 288  ;;  %1866 = vbcast.lane.b32.xlu1 %v4222_v21, 296 }
 0x11c   : > { %v4259_v36 = vpop.permute.xlu0 %1610  ;;  %v4262_v38 = vpop.permute.xlu1 %1614 }
 0x11e   : > { %1937 = vbcast.lane.b32.xlu0 %v4210_v15, 304  ;;  %1941 = vbcast.lane.b32.xlu1 %v4210_v15, 312 }
 0x11f   : > { %3095 = vmatmul.mubr.bf16.gmra.mrb[64].mxu0 %v3433_v25 }
 0x120   : > { %3098 = vmatprep.mubr.bf16.mxu0 %v3436_v27  ;;  %v4267_v40 = vpop.permute.xlu0 %1685  ;;  %v4269_v41 = vpop.permute.xlu1 %1689  ;;  %v4361_v27 = vand.u32 127, %v1573_v6 }
 0x122   : > { %1870 = vbcast.lane.b32.xlu0 %v4222_v21, 304  ;;  %1874 = vbcast.lane.b32.xlu1 %v4222_v21, 312 }
 0x124   : > { %v4273_v42 = vpop.permute.xlu0 %1618  ;;  %v4276_v44 = vpop.permute.xlu1 %1622 }
 0x126   : > { %1945 = vbcast.lane.b32.xlu0 %v4210_v15, 320  ;;  %1949 = vbcast.lane.b32.xlu1 %v4210_v15, 328 }
 0x127   : > { %3099 = vmatmul.mubr.bf16.gmra.mrb[68].mxu0 %v3437_v31  ;;  %v4364_v31 = vmul.u32 128, %v4064_v8 }
 0x128   : > { %3102 = vmatprep.mubr.bf16.mxu0 %v3440_v33  ;;  %v4281_v46 = vpop.permute.xlu0 %1693  ;;  %v4283_v47 = vpop.permute.xlu1 %1697 }
 0x129   : > { %vm2249_vm4 = vcmp.ge.s32.totalorder %v4361_v27, %v4364_v31 }
 0x12a   : > { %1878 = vbcast.lane.b32.xlu0 %v4222_v21, 320  ;;  %1882 = vbcast.lane.b32.xlu1 %v4222_v21, 328 }
 0x12c   : > { %v4287_v48 = vpop.permute.xlu0 %1626  ;;  %v4290_v50 = vpop.permute.xlu1 %1630 }
 0x12e   : > { %1953 = vbcast.lane.b32.xlu0 %v4210_v15, 336  ;;  %1957 = vbcast.lane.b32.xlu1 %v4210_v15, 344 }
 0x12f   : > { %3103 = vmatmul.mubr.bf16.gmra.mrb[72].mxu0 %v3441_v37 }
 0x130   : > { %3106 = vmatprep.mubr.bf16.mxu0 %v3444_v39  ;;  %v4295_v52 = vpop.permute.xlu0 %1701  ;;  %v4297_v53 = vpop.permute.xlu1 %1705  ;;  %v2241_v39 = vadd.s32 128, %v4361_v27 }
 0x132   : > { %1886 = vbcast.lane.b32.xlu0 %v4222_v21, 336  ;;  %1890 = vbcast.lane.b32.xlu1 %v4222_v21, 344  ;;  %vm2250_vm1 = vcmp.ge.s32.totalorder %v2241_v39, %v4364_v31 }
 0x134   : > { %v4301_v54 = vpop.permute.xlu0 %1634  ;;  %v4304_v56 = vpop.permute.xlu1 %1638 }
 0x136   : > { %1961 = vbcast.lane.b32.xlu0 %v4210_v15, 352  ;;  %1965 = vbcast.lane.b32.xlu1 %v4210_v15, 360 }
 0x137   : > { %3107 = vmatmul.mubr.bf16.gmra.mrb[76].mxu0 %v3445_v43  ;;  %v4372_v43 = vadd.s32 128, %v4364_v31 }
 0x138   : > { %3110 = vmatprep.mubr.bf16.mxu0 %v3448_v45  ;;  %v4309_v58 = vpop.permute.xlu0 %1779  ;;  %v4311_v59 = vpop.permute.xlu1 %1783  ;;  %v5361_v45 = vmov 1.0  }
 0x139   : > { %5394 = vst [vmem:[#allocation18_spill] sm:$0xff] %v4309_v58  ;;  %5395 = vst [vmem:[#allocation19_spill] sm:$0xff] %v4311_v59  ;;  %vm2259_vm2 = vcmp.lt.s32.totalorder %v2241_v39, %v4372_v43  ;;  %vm2258_vm5 = vcmp.lt.s32.totalorder %v4361_v27, %v4372_v43 }
 0x13a   : > { %1894 = vbcast.lane.b32.xlu0 %v4222_v21, 352  ;;  %1898 = vbcast.lane.b32.xlu1 %v4222_v21, 360  ;;  %vm2267_vm3 = vmand %vm2250_vm1, %vm2259_vm2 }
 0x13b   : > { %2788 = vmatprep.mubr.msk.f32.mxu1 %vm2267_vm3, %v5361_v45  ;;  %vm4800_vm8 = vmand %vm2249_vm4, %vm2258_vm5 }
 0x13c   : > { %v4315_v60 = vpop.permute.xlu0 %1712  ;;  %v4318_v62 = vpop.permute.xlu1 %1716 }
 0x13d   : > { %5396 = vst [vmem:[#allocation20_spill] sm:$0xff] %v4315_v60  ;;  %5397 = vst [vmem:[#allocation21_spill] sm:$0xff] %v4318_v62 }
 0x13e   : > { %1969 = vbcast.lane.b32.xlu0 %v4210_v15, 368  ;;  %1973 = vbcast.lane.b32.xlu1 %v4210_v15, 376  ;;  %v4339_v15 = vrot.slane %v4069_v13, %v1977_v7 }
 0x13f   : > { %3111 = vmatmul.mubr.bf16.gmra.mrb[80].mxu0 %v3449_v49 }
 0x140   : > { %3114 = vmatprep.mubr.bf16.mxu0 %v3452_v51  ;;  %v4323_v0 = vpop.permute.xlu0 %1787  ;;  %v4325_v1 = vpop.permute.xlu1 %1791 }
 0x141   : > { %5398 = vst [vmem:[#allocation22_spill] sm:$0xff] %v4323_v0  ;;  %5399 = vst [vmem:[#allocation23_spill] sm:$0xff] %v4325_v1 }
 0x142   : > { %1902 = vbcast.lane.b32.xlu0 %v4222_v21, 368  ;;  %1906 = vbcast.lane.b32.xlu1 %v4222_v21, 376 }
 0x144   : > { %v4333_v10 = vpop.permute.xlu0 %1720  ;;  %v4335_v11 = vpop.permute.xlu1 %1724 }
 0x145   : > { %5400 = vst [vmem:[#allocation24_spill] sm:$0xff] %v4333_v10  ;;  %5401 = vst [vmem:[#allocation25_spill] sm:$0xff] %v4335_v11 }
 0x146   : > { %2047 = vbcast.lane.b32.xlu0 %v4329_v2, 256  ;;  %2051 = vbcast.lane.b32.xlu1 %v4329_v2, 264 }
 0x147   : > { %3115 = vmatmul.mubr.bf16.gmra.mrb[84].mxu0 %v3453_v55 }
 0x148   : > { %3118 = vmatprep.mubr.bf16.mxu0 %v3454_v57  ;;  %v4342_v16 = vpop.permute.xlu0 %1795  ;;  %v4344_v18 = vpop.permute.xlu1 %1799 }
 0x149   : > { %5402 = vst [vmem:[#allocation26_spill] sm:$0xff] %v4342_v16  ;;  %5403 = vst [vmem:[#allocation27_spill] sm:$0xff] %v4344_v18 }
 0x14a   : > { %1980 = vbcast.lane.b32.xlu0 %v4339_v15, 256  ;;  %1984 = vbcast.lane.b32.xlu1 %v4339_v15, 264 }
 0x14c   : > { %v4348_v20 = vpop.permute.xlu0 %1728  ;;  %v4350_v21 = vpop.permute.xlu1 %1732 }
 0x14d   : > { %5404 = vst [vmem:[#allocation28_spill] sm:$0xff] %v4348_v20  ;;  %5405 = vst [vmem:[#allocation29_spill] sm:$0xff] %v4350_v21 }
 0x14e   : > { %2055 = vbcast.lane.b32.xlu0 %v4329_v2, 272  ;;  %2059 = vbcast.lane.b32.xlu1 %v4329_v2, 280 }
 0x14f   : > { %3119 = vmatmul.mubr.bf16.gmra.mrb[88].mxu0 %v3455_v61  ;;  %v4398_v61 = vld [vmem:[%s5355_s3] ss:$0 sm:$0xff] }
 0x150   : > { %v4354_v13 = vpop.permute.xlu0 %1803  ;;  %v4356_v25 = vpop.permute.xlu1 %1807 }
 0x151   : > { %5406 = vst [vmem:[#allocation30_spill] sm:$0xff] %v4354_v13  ;;  %5407 = vst [vmem:[#allocation31_spill] sm:$0xff] %v4356_v25 }
 0x152   : > { %1988 = vbcast.lane.b32.xlu0 %v4339_v15, 272  ;;  %1992 = vbcast.lane.b32.xlu1 %v4339_v15, 280 }
 0x154   : > { %v4366_v33 = vpop.permute.xlu0 %1736  ;;  %v4368_v37 = vpop.permute.xlu1 %1740 }
 0x155   : > { %5408 = vst [vmem:[#allocation32_spill] sm:$0xff] %v4366_v33  ;;  %5409 = vst [vmem:[#allocation33_spill] sm:$0xff] %v4368_v37 }
 0x156   : > { %2063 = vbcast.lane.b32.xlu0 %v4329_v2, 288  ;;  %2067 = vbcast.lane.b32.xlu1 %v4329_v2, 296 }
 0x158   : > { %v4378_v6 = vpop.permute.xlu0 %1811  ;;  %v4380_v8 = vpop.permute.xlu1 %1815 }
 0x159   : > { %5410 = vst [vmem:[#allocation34_spill] sm:$0xff] %v4378_v6  ;;  %5411 = vst [vmem:[#allocation35_spill] sm:$0xff] %v4380_v8 }
 0x15a   : > { %1996 = vbcast.lane.b32.xlu0 %v4339_v15, 288  ;;  %2000 = vbcast.lane.b32.xlu1 %v4339_v15, 296 }
 0x15c   : > { %v4385_v49 = vpop.permute.xlu0 %1744  ;;  %v4387_v51 = vpop.permute.xlu1 %1748 }
 0x15d   : > { %5412 = vst [vmem:[#allocation36_spill] sm:$0xff] %v4385_v49  ;;  %5413 = vst [vmem:[#allocation37_spill] sm:$0xff] %v4387_v51 }
 0x15e   : > { %2071 = vbcast.lane.b32.xlu0 %v4329_v2, 304  ;;  %2075 = vbcast.lane.b32.xlu1 %v4329_v2, 312 }
 0x160   : > { %v4391_v55 = vpop.permute.xlu0 %1819  ;;  %v4393_v57 = vpop.permute.xlu1 %1823 }
 0x161   : > { %5414 = vst [vmem:[#allocation38_spill] sm:$0xff] %v4391_v55  ;;  %5415 = vst [vmem:[#allocation39_spill] sm:$0xff] %v4393_v57 }
 0x162   : > { %2004 = vbcast.lane.b32.xlu0 %v4339_v15, 304  ;;  %2008 = vbcast.lane.b32.xlu1 %v4339_v15, 312 }
 0x164   : > { %v4402_v7 = vpop.permute.xlu0 %1752  ;;  %v4405_v8 = vpop.permute.xlu1 %1756 }
 0x165   : > { %5416 = vst [vmem:[#allocation40_spill] sm:$0xff] %v4402_v7  ;;  %5417 = vst [vmem:[#allocation41_spill] sm:$0xff] %v4405_v8 }
 0x166   : > { %2079 = vbcast.lane.b32.xlu0 %v4329_v2, 320  ;;  %2083 = vbcast.lane.b32.xlu1 %v4329_v2, 328 }
 0x168   : > { %v4412_v25 = vpop.permute.xlu0 %1827 }
 0x169   : > { %5418 = vst [vmem:[#allocation42_spill] sm:$0xff] %v4412_v25 }
 0x16a   : > { %2012 = vbcast.lane.b32.xlu0 %v4339_v15, 320  ;;  %2016 = vbcast.lane.b32.xlu1 %v4339_v15, 328 }
 0x16e   : > { %2087 = vbcast.lane.b32.xlu0 %v4329_v2, 336  ;;  %2091 = vbcast.lane.b32.xlu1 %v4329_v2, 344 }
 0x172   : > { %v3032_v63 = vpop.f32.mrb[0].mxu0  ;;  %v4432_v1 = vpop.f32.mrb[0].mxu1  ;;  %2020 = vbcast.lane.b32.xlu0 %v4339_v15, 336  ;;  %2024 = vbcast.lane.b32.xlu1 %v4339_v15, 344 }
 0x173   : > { %v942_v39 = vadd.f32 %v3032_v63, %v4398_v61  ;;  %v933_v45 = vpop.f32.mrb[1].mxu0  ;;  %v4414_v63 = vpop.permute.xlu1 %1831 }
 0x174   : > { %v934_v6 = vadd.f32 %v4398_v61, %v933_v45  ;;  %v3033_v57 = vpop.f32.mrb[2].mxu0  ;;  %5419 = vst [vmem:[#allocation43_spill] sm:$0xff] %v4414_v63 }
 0x175   : > { %3462 = vtanh.f32 %v942_v39  ;;  %v945_v55 = vadd.f32 %v3033_v57, %v4398_v61  ;;  %v936_v18 = vpop.f32.mrb[3].mxu0  ;;  %v4418_v39 = vpop.permute.xlu0 %1760 }
 0x176   : > { %3464 = vtanh.f32 %v934_v6  ;;  %v937_v16 = vadd.f32 %v4398_v61, %v936_v18  ;;  %5420 = vst [vmem:[#allocation44_spill] sm:$0xff] %v4418_v39  ;;  %2095 = vbcast.lane.b32.xlu0 %v4329_v2, 352  ;;  %2099 = vbcast.lane.b32.xlu1 %v4329_v2, 360 }
 0x177   : > { %3466 = vtanh.f32 %v945_v55  ;;  %v4421_v59 = vpop.permute.xlu1 %1764 }
 0x178   : > { %3468 = vtanh.f32 %v937_v16  ;;  %5421 = vst [vmem:[#allocation45_spill] sm:$0xff] %v4421_v59 }
 0x179   : > { %v4428_v25 = vpop.permute.xlu0 %1835 }
 0x17a   : > { %v3036_v45 = vpop.f32.mrb[4].mxu0  ;;  %5422 = vst [vmem:[#allocation46_spill] sm:$0xff] %v4428_v25  ;;  %2028 = vbcast.lane.b32.xlu0 %v4339_v15, 352  ;;  %2032 = vbcast.lane.b32.xlu1 %v4339_v15, 360 }
 0x17b   : > { %v958_v57 = vadd.f32 %v3036_v45, %v4398_v61  ;;  %v949_v13 = vpop.f32.mrb[5].mxu0  ;;  %v4430_v58 = vpop.permute.xlu1 %1839 }
 0x17c   : > { %v950_v18 = vadd.f32 %v4398_v61, %v949_v13  ;;  %v3037_v6 = vpop.f32.mrb[6].mxu0  ;;  %5423 = vst [vmem:[#allocation47_spill] sm:$0xff] %v4430_v58 }
 0x17d   : > { %3470 = vtanh.f32 %v958_v57  ;;  %v961_v16 = vadd.f32 %v3037_v6, %v4398_v61  ;;  %v952_v55 = vpop.f32.mrb[7].mxu0  ;;  %v4435_v57 = vpop.f32.mrb[1].mxu1 }
 0x17e   : > { %3472 = vtanh.f32 %v950_v18  ;;  %v953_v63 = vadd.f32 %v4398_v61, %v952_v55  ;;  %v4438_v18 = vpop.f32.mrb[2].mxu1  ;;  %v4446_v58 = vpop.permute.xlu0 %1768  ;;  %2103 = vbcast.lane.b32.xlu0 %v4329_v2, 368  ;;  %2107 = vbcast.lane.b32.xlu1 %v4329_v2, 376 }
 0x17f   : > { %v3463_v45 = vpop.eup %3462  ;;  %3474 = vtanh.f32 %v961_v16  ;;  %5424 = vst [vmem:[#allocation48_spill] sm:$0xff] %v4446_v58  ;;  %v4455_v49 = vpop.permute.xlu1 %1772 }
 0x180   : > { %v3465_v13 = vpop.eup %3464  ;;  %3476 = vtanh.f32 %v953_v63  ;;  %v4441_v25 = vmul.f32 %v3463_v45, %v4214_v17  ;;  %5425 = vst [vmem:[#allocation49_spill] sm:$0xff] %v4455_v49  ;;  %v4461_v45 = vpop.f32.mrb[3].mxu1 }
 0x181   : > { %v3467_v6 = vpop.eup %3466  ;;  %v4450_v39 = vmul.f32 %v3465_v13, %v4191_v4  ;;  %v4467_v13 = vpop.f32.mrb[4].mxu1 }
 0x182   : > { %v3469_v55 = vpop.eup %3468  ;;  %v3040_v0 = vpop.f32.mrb[8].mxu0  ;;  %v4444_v16 = vmul.f32 %v3467_v6, %v4217_v19  ;;  %2036 = vbcast.lane.b32.xlu0 %v4339_v15, 368  ;;  %2040 = vbcast.lane.b32.xlu1 %v4339_v15, 376 }
 0x183   : > { %v974_v63 = vadd.f32 %v3040_v0, %v4398_v61  ;;  %v965_v59 = vpop.f32.mrb[9].mxu0  ;;  %v4453_v51 = vmul.f32 %v3469_v55, %v4198_v9  ;;  %v4470_v6 = vpop.permute.xlu0 %1913 }
 0x184   : > { %v966_v8 = vadd.f32 %v4398_v61, %v965_v59  ;;  %v3041_v17 = vpop.f32.mrb[10].mxu0  ;;  %5426 = vst [vmem:[#allocation50_spill] sm:$0xff] %v4470_v6  ;;  %v4472_v55 = vpop.f32.mrb[5].mxu1 }
 0x185   : > { %3478 = vtanh.f32 %v974_v63  ;;  %v977_v0 = vadd.f32 %v3041_v17, %v4398_v61  ;;  %v968_v4 = vpop.f32.mrb[11].mxu0  ;;  %v4474_v63 = vpop.permute.xlu1 %1917 }
 0x186   : > { %3480 = vtanh.f32 %v966_v8  ;;  %v969_v59 = vadd.f32 %v4398_v61, %v968_v4  ;;  %5427 = vst [vmem:[#allocation51_spill] sm:$0xff] %v4474_v63  ;;  %v4476_v17 = vpop.f32.mrb[6].mxu1 }
 0x187   : > { %v3471_v19 = vpop.eup %3470  ;;  %3482 = vtanh.f32 %v977_v0  ;;  %v4479_v9 = vpop.f32.mrb[7].mxu1 }
 0x188   : > { %v3473_v49 = vpop.eup %3472  ;;  %3484 = vtanh.f32 %v969_v59  ;;  %v4483_v6 = vmul.f32 %v3471_v19, %v4245_v30  ;;  %v4488_v63 = vpop.permute.xlu0 %1846 }
 0x189   : > { %v3475_v58 = vpop.eup %3474  ;;  %5428 = vst [vmem:[#allocation52_spill] sm:$0xff] %v4488_v63  ;;  %v4492_v21 = vmul.f32 %v3473_v49, %v4231_v24  ;;  %v4497_v37 = vpop.permute.xlu1 %1850 }
 0x18a   : > { %v3477_v8 = vpop.eup %3476  ;;  %v3044_v4 = vpop.f32.mrb[12].mxu0  ;;  %v4486_v0 = vmul.f32 %v3475_v58, %v4248_v32  ;;  %5429 = vst [vmem:[#allocation53_spill] sm:$0xff] %v4497_v37 }
 0x18b   : > { %v990_v7 = vadd.f32 %v3044_v4, %v4398_v61  ;;  %v981_v59 = vpop.f32.mrb[13].mxu0  ;;  %v4495_v20 = vmul.f32 %v3477_v8, %v4234_v26  ;;  %v4507_v26 = vpop.f32.mrb[8].mxu1 }
 0x18c   : > { %v982_v33 = vadd.f32 %v4398_v61, %v981_v59  ;;  %v3045_v30 = vpop.f32.mrb[14].mxu0  ;;  %v4510_v8 = vpop.permute.xlu0 %1921 }
 0x18d   : > { %3486 = vtanh.f32 %v990_v7  ;;  %v993_v58 = vadd.f32 %v3045_v30, %v4398_v61  ;;  %v984_v19 = vpop.f32.mrb[15].mxu0  ;;  %5430 = vst [vmem:[#allocation54_spill] sm:$0xff] %v4510_v8  ;;  %v4512_v4 = vpop.f32.mrb[9].mxu1 }
 0x18e   : > { %3488 = vtanh.f32 %v982_v33  ;;  %v985_v49 = vadd.f32 %v4398_v61, %v984_v19  ;;  %v4514_v7 = vpop.permute.xlu1 %1925  ;;  %v4516_v30 = vpop.f32.mrb[10].mxu1 }
 0x18f   : > { %v3479_v59 = vpop.eup %3478  ;;  %3490 = vtanh.f32 %v993_v58  ;;  %5431 = vst [vmem:[#allocation55_spill] sm:$0xff] %v4514_v7  ;;  %v4519_v2 = vpop.f32.mrb[11].mxu1 }
 0x190   : > { %v3481_v32 = vpop.eup %3480  ;;  %3492 = vtanh.f32 %v985_v49  ;;  %v4523_v8 = vmul.f32 %v3479_v59, %v4273_v42  ;;  %v4528_v7 = vpop.permute.xlu0 %1854 }
 0x191   : > { %v3483_v24 = vpop.eup %3482  ;;  %5432 = vst [vmem:[#allocation56_spill] sm:$0xff] %v4528_v7  ;;  %v4532_v63 = vmul.f32 %v3481_v32, %v4259_v36  ;;  %v4545_v36 = vpop.f32.mrb[12].mxu1 }
 0x192   : > { %v3485_v33 = vpop.eup %3484  ;;  %v3048_v19 = vpop.f32.mrb[16].mxu0  ;;  %v4526_v58 = vmul.f32 %v3483_v24, %v4276_v44 }
 0x193   : > { %v1006_v37 = vadd.f32 %v3048_v19, %v4398_v61  ;;  %v997_v49 = vpop.f32.mrb[17].mxu0  ;;  %v4535_v62 = vmul.f32 %v3485_v33, %v4262_v38  ;;  %v4537_v15 = vpop.permute.xlu1 %1858 }
 0x194   : > { %5433 = vst [vmem:[#allocation57_spill] sm:$0xff] %v4537_v15  ;;  %v998_v60 = vadd.f32 %v4398_v61, %v997_v49  ;;  %v3049_v42 = vpop.f32.mrb[18].mxu0  ;;  %v4548_v32 = vpop.permute.xlu0 %1929 }
 0x195   : > { %3494 = vtanh.f32 %v1006_v37  ;;  %v1009_v24 = vadd.f32 %v3049_v42, %v4398_v61  ;;  %v1000_v59 = vpop.f32.mrb[19].mxu0  ;;  %5434 = vst [vmem:[#allocation58_spill] sm:$0xff] %v4548_v32  ;;  %v4550_v33 = vpop.f32.mrb[13].mxu1 }
 0x196   : > { %3496 = vtanh.f32 %v998_v60  ;;  %v1001_v38 = vadd.f32 %v4398_v61, %v1000_v59  ;;  %v4554_v37 = vpop.f32.mrb[14].mxu1 }
 0x197   : > { %v3487_v49 = vpop.eup %3486  ;;  %3498 = vtanh.f32 %v1009_v24  ;;  %v4552_v15 = vpop.permute.xlu1 %1933  ;;  %5436 = vst [vmem:[#allocation60_spill] sm:$0xff] %v4554_v37 }
 0x198   : > { %5435 = vst [vmem:[#allocation59_spill] sm:$0xff] %v4552_v15  ;;  %v3489_v42 = vpop.eup %3488  ;;  %3500 = vtanh.f32 %v1001_v38  ;;  %v4556_v44 = vpop.f32.mrb[15].mxu1  ;;  %v4559_v60 = vmul.f32 %v3487_v49, %v4301_v54 }
 0x199   : > { %5437 = vst [vmem:[#allocation61_spill] sm:$0xff] %v4556_v44  ;;  %v3491_v19 = vpop.eup %3490  ;;  %v4564_v32 = vpop.permute.xlu0 %1862  ;;  %v4568_v37 = vmul.f32 %v3489_v42, %v4287_v48 }
 0x19a   : > { %v3493_v7 = vpop.eup %3492  ;;  %v3052_v11 = vpop.f32.mrb[20].mxu0  ;;  %5438 = vst [vmem:[#allocation62_spill] sm:$0xff] %v4559_v60  ;;  %v4562_v59 = vmul.f32 %v3491_v19, %v4304_v56  ;;  %5440 = vst [vmem:[#allocation64_spill] sm:$0xff] %v4564_v32 }
 0x19b   : > { %v1022_v24 = vadd.f32 %v3052_v11, %v4398_v61  ;;  %v1013_v15 = vpop.f32.mrb[21].mxu0  ;;  %v4571_v38 = vmul.f32 %v3493_v7, %v4290_v50  ;;  %v4573_v44 = vpop.permute.xlu1 %1866 }
 0x19c   : > { %5439 = vst [vmem:[#allocation63_spill] sm:$0xff] %v4562_v59  ;;  %5441 = vst [vmem:[#allocation65_spill] sm:$0xff] %v4573_v44  ;;  %v1014_v10 = vadd.f32 %v4398_v61, %v1013_v15  ;;  %v3053_v54 = vpop.f32.mrb[22].mxu0  ;;  %v4581_v48 = vpop.f32.mrb[16].mxu1 }
 0x19d   : > { %3502 = vtanh.f32 %v1022_v24  ;;  %v1025_v19 = vadd.f32 %v3053_v54, %v4398_v61  ;;  %v1016_v49 = vpop.f32.mrb[23].mxu0  ;;  %5442 = vst [vmem:[#allocation66_spill] sm:$0xff] %v4581_v48  ;;  %v4584_v7 = vpop.permute.xlu0 %1937  ;;  %v1310_v24 = vadd.f32 %v4432_v1, %v4398_v61 }
 0x19e   : > { %3504 = vtanh.f32 %v1014_v10  ;;  %v1017_v50 = vadd.f32 %v4398_v61, %v1016_v49  ;;  %5443 = vst [vmem:[#allocation67_spill] sm:$0xff] %v4584_v7  ;;  %v4586_v42 = vpop.f32.mrb[17].mxu1  ;;  %v1302_v10 = vadd.f32 %v4398_v61, %v4435_v57 }
 0x19f   : > { %5444 = vst [vmem:[#allocation68_spill] sm:$0xff] %v4586_v42  ;;  %v3495_v15 = vpop.eup %3494  ;;  %3506 = vtanh.f32 %v1025_v19  ;;  %v4588_v44 = vpop.permute.xlu1 %1941 }
 0x1a0   : > { %5445 = vst [vmem:[#allocation69_spill] sm:$0xff] %v4588_v44  ;;  %v4592_v54 = vpop.f32.mrb[18].mxu1  ;;  %v3497_v56 = vpop.eup %3496  ;;  %3508 = vtanh.f32 %v1017_v50  ;;  %v2127_v42 = vmul.f32 %v3495_v15, %v4204_v12 }
 0x1a1   : > { %5446 = vst [vmem:[#allocation70_spill] sm:$0xff] %v4592_v54  ;;  %v4596_v11 = vpop.f32.mrb[19].mxu1  ;;  %v3499_v49 = vpop.eup %3498  ;;  %v2125_v54 = vmul.f32 %v3497_v56, %v4189_v3  ;;  %3510 = vtanh.f32 %v1310_v24  ;;  %v1305_v56 = vadd.f32 %v4398_v61, %v4461_v45  ;;  %v1318_v45 = vadd.f32 %v4398_v61, %v4472_v55 }
 0x1a2   : > { %5447 = vst [vmem:[#allocation71_spill] sm:$0xff] %v4596_v11  ;;  %v3501_v7 = vpop.eup %3500  ;;  %v3056_v32 = vpop.f32.mrb[24].mxu0  ;;  %v2128_v19 = vmul.f32 %v3499_v49, %v4206_v14  ;;  %3512 = vtanh.f32 %v1302_v10 }
 0x1a3   : > { %v4600_v44 = vpop.permute.xlu0 %1870  ;;  %v1038_v1 = vadd.f32 %v3056_v32, %v4398_v61  ;;  %v1029_v48 = vpop.f32.mrb[25].mxu0  ;;  %v2126_v50 = vmul.f32 %v3501_v7, %v4195_v5  ;;  %v1313_v32 = vadd.f32 %v4438_v18, %v4398_v61  ;;  %v1326_v18 = vadd.f32 %v4467_v13, %v4398_v61 }
 0x1a4   : > { %v4605_v60 = vpop.permute.xlu1 %1874  ;;  %v1030_v57 = vadd.f32 %v4398_v61, %v1029_v48  ;;  %v3057_v11 = vpop.f32.mrb[26].mxu0  ;;  %v3162_v59 = vpack.c.bf16 %v2128_v19, %v2127_v42 }
 0x1a5   : > { %3514 = vtanh.f32 %v1038_v1  ;;  %v1041_v12 = vadd.f32 %v3057_v11, %v4398_v61  ;;  %v1032_v14 = vpop.f32.mrb[27].mxu0  ;;  %v3158_v15 = vpack.c.bf16 %v2126_v50, %v2125_v54  ;;  %v4611_v49 = vpop.f32.mrb[20].mxu1  ;;  %v5450_v54 = vpack.c.bf16 %v4453_v51, %v4450_v39 }
 0x1a6   : > { %3516 = vtanh.f32 %v1030_v57  ;;  %v1033_v3 = vadd.f32 %v4398_v61, %v1032_v14  ;;  %v4618_v48 = vpop.f32.mrb[21].mxu1 }
 0x1a7   : > { %v4614_v5 = vpop.permute.xlu0 %1945  ;;  %v3503_v7 = vpop.eup %3502  ;;  %3518 = vtanh.f32 %v1041_v12  ;;  %3159 = vmatprep.subr.bf16.mxu1 %v3158_v15 }
 0x1a8   : > { %5448 = vst [vmem:[#allocation72_spill] sm:$0xff] %v4614_v5  ;;  %v4620_v11 = vpop.permute.xlu1 %1949  ;;  %v4624_v42 = vpop.f32.mrb[22].mxu1  ;;  %3520 = vtanh.f32 %v1033_v3  ;;  %3161 = vmatpush3.bf16.msra.mxu1 %v5450_v54  ;;  %v2131_v13 = vmul.f32 %v3503_v7, %v4239_v28  ;;  %v5451_v28 = vpack.c.bf16 %v4444_v16, %v4441_v25  ;;  %v1329_v7 = vadd.f32 %v4476_v17, %v4398_v61 }
 0x1a9   : > { %5449 = vst [vmem:[#allocation73_spill] sm:$0xff] %v4620_v11  ;;  %v3505_v24 = vpop.eup %3504  ;;  %v4631_v10 = vpop.f32.mrb[23].mxu1  ;;  %3163 = vmatprep.subr.bf16.mxu1 %v3162_v59  ;;  %3522 = vtanh.f32 %v1313_v32  ;;  %v1321_v54 = vadd.f32 %v4398_v61, %v4479_v9  ;;  %v1342_v17 = vadd.f32 %v4507_v26, %v4398_v61  ;;  %v1334_v9 = vadd.f32 %v4398_v61, %v4512_v4 }
 0x1aa   : > { %v3507_v19 = vpop.eup %3506  ;;  %v3060_v50 = vpop.f32.mrb[28].mxu0  ;;  %3524 = vtanh.f32 %v1305_v56  ;;  %v2129_v14 = vmul.f32 %v3505_v24, %v4225_v22 }
 0x1ab   : > { %v3509_v1 = vpop.eup %3508  ;;  %v2132_v57 = vmul.f32 %v3507_v19, %v4241_v29  ;;  %v4635_v12 = vpop.permute.xlu0 %1878  ;;  %v1054_v51 = vadd.f32 %v3060_v50, %v4398_v61  ;;  %3526 = vtanh.f32 %v1326_v18 }
 0x1ac   : > { %v1045_v39 = vpop.f32.mrb[29].mxu0  ;;  %v2130_v55 = vmul.f32 %v3509_v1, %v4227_v23  ;;  %v4640_v15 = vpop.permute.xlu1 %1882  ;;  %3165 = vmatpush3.bf16.msra.mxu1 %v5451_v28  ;;  %3528 = vtanh.f32 %v1318_v45 }
 0x1ad   : > { %v1046_v59 = vadd.f32 %v4398_v61, %v1045_v39  ;;  %v3061_v32 = vpop.f32.mrb[30].mxu0  ;;  %v3170_v29 = vpack.c.bf16 %v2132_v57, %v2131_v13  ;;  %v4646_v3 = vpop.eup %3510  ;;  %3530 = vtanh.f32 %v1054_v51  ;;  %v3718_v13 = vld [vmem:[%s4051_s23] sm:$0xff]  ;;  %v5454_v51 = vpack.c.bf16 %v4495_v20, %v4492_v21 }
 0x1ae   : > { %v1057_v56 = vadd.f32 %v3061_v32, %v4398_v61  ;;  %v1048_v22 = vpop.f32.mrb[31].mxu0  ;;  %v3166_v23 = vpack.c.bf16 %v2130_v55, %v2129_v14  ;;  %v4651_v18 = vpop.f32.mrb[24].mxu1  ;;  %2566 = vadd.xlane.f32.xlu0 %v3718_v13 }
 0x1af   : > { %v3513_v24 = vpop.eup %3512  ;;  %3532 = vtanh.f32 %v1046_v59  ;;  %v1049_v25 = vadd.f32 %v4398_v61, %v1048_v22  ;;  %v4654_v16 = vpop.permute.xlu0 %1953 }
 0x1b0   : > { %5452 = vst [vmem:[#allocation74_spill] sm:$0xff] %v4654_v16  ;;  %v4658_v45 = vpop.f32.mrb[25].mxu1  ;;  %v3515_v19 = vpop.eup %3514  ;;  %3534 = vtanh.f32 %v1057_v56  ;;  %3167 = vmatprep.subr.bf16.mxu1 %v3166_v23 }
 0x1b1   : > { %v4660_v1 = vpop.permute.xlu1 %1957  ;;  %v4664_v50 = vpop.f32.mrb[26].mxu1  ;;  %3536 = vtanh.f32 %v1049_v25  ;;  %3169 = vmatpush3.bf16.msra.mxu1 %v5454_v51  ;;  %v2135_v59 = vmul.f32 %v3515_v19, %v4267_v40  ;;  %v1382_v51 = vadd.f32 %v4398_v61, %v4618_v48  ;;  %v1337_v48 = vadd.f32 %v4398_v61, %v4519_v2 }
 0x1b2   : > { %5453 = vst [vmem:[#allocation75_spill] sm:$0xff] %v4660_v1  ;;  %v3517_v57 = vpop.eup %3516  ;;  %v4672_v39 = vpop.f32.mrb[27].mxu1  ;;  %3171 = vmatprep.subr.bf16.mxu1 %v3170_v29  ;;  %3538 = vtanh.f32 %v1329_v7 }
 0x1b3   : > { %v3519_v14 = vpop.eup %3518  ;;  %v3064_v26 = vpop.f32.mrb[32].mxu0  ;;  %3540 = vtanh.f32 %v1321_v54  ;;  %v2133_v4 = vmul.f32 %v3517_v57, %v4253_v34 }
 0x1b4   : > { %v3521_v55 = vpop.eup %3520  ;;  %v2136_v32 = vmul.f32 %v3519_v14, %v4269_v41  ;;  %v4676_v28 = vpop.permute.xlu0 %1886  ;;  %v1070_v20 = vadd.f32 %v3064_v26, %v4398_v61  ;;  %3542 = vtanh.f32 %v1342_v17  ;;  %v5455_v41 = vpack.c.bf16 %v4486_v0, %v4483_v6 }
 0x1b5   : > { %v4678_v56 = vpop.eup %3522  ;;  %v1061_v21 = vpop.f32.mrb[33].mxu0  ;;  %v2134_v22 = vmul.f32 %v3521_v55, %v4255_v35  ;;  %3544 = vtanh.f32 %v1334_v9  ;;  %v1345_v17 = vadd.f32 %v4516_v30, %v4398_v61  ;;  %v1385_v30 = vadd.f32 %v4398_v61, %v4631_v10 }
 0x1b6   : > { %v4683_v29 = vpop.permute.xlu1 %1890  ;;  %v3525_v23 = vpop.eup %3524  ;;  %v1062_v40 = vadd.f32 %v4398_v61, %v1061_v21  ;;  %3173 = vmatpush3.bf16.msra.mxu1 %v5455_v41  ;;  %v3178_v25 = vpack.c.bf16 %v2136_v32, %v2135_v59  ;;  %3546 = vtanh.f32 %v1070_v20  ;;  %v5457_v20 = vpack.c.bf16 %v4535_v62, %v4532_v63 }
 0x1b7   : > { %v3065_v7 = vpop.f32.mrb[34].mxu0  ;;  %v4689_v54 = vpop.eup %3526  ;;  %v3174_v35 = vpack.c.bf16 %v2134_v22, %v2133_v4 }
 0x1b8   : > { %v1073_v34 = vadd.f32 %v3065_v7, %v4398_v61  ;;  %v1064_v19 = vpop.f32.mrb[35].mxu0  ;;  %v4694_v13 = vpop.f32.mrb[28].mxu1  ;;  %3548 = vtanh.f32 %v1062_v40 }
 0x1b9   : > { %v4696_v57 = vpop.eup %3528  ;;  %v1065_v6 = vadd.f32 %v4398_v61, %v1064_v19  ;;  %v1962_v0 = vpop.permute.xlu0 %1961  ;;  %3175 = vmatprep.subr.bf16.mxu1 %v3174_v35 }
 0x1ba   : > { %v4701_v9 = vpop.f32.mrb[29].mxu1  ;;  %v3531_v14 = vpop.eup %3530  ;;  %3550 = vtanh.f32 %v1073_v34  ;;  %v4707_v59 = vmul.f32 %v3513_v24, %v1962_v0  ;;  %3177 = vmatpush3.bf16.msra.mxu1 %v5457_v20  ;;  %v2243_v0 = vadd.s32 384, %v4361_v27 }
 0x1bb   : > { %v1966_v55 = vpop.permute.xlu1 %1965  ;;  %v4705_v26 = vpop.f32.mrb[30].mxu1  ;;  %3552 = vtanh.f32 %v1065_v6  ;;  %3179 = vmatprep.subr.bf16.mxu1 %v3178_v25  ;;  %v2139_v24 = vmul.f32 %v3531_v14, %v4295_v52 }
 0x1bc   : > { %5456 = vst [vmem:[#allocation76_spill] sm:$0xff] %v4707_v59  ;;  %v3533_v32 = vpop.eup %3532  ;;  %v4714_v21 = vpop.f32.mrb[31].mxu1  ;;  %v4716_v4 = vmul.f32 %v3525_v23, %v1966_v55  ;;  %3554 = vtanh.f32 %v1345_v17  ;;  %v5460_v17 = vpack.c.bf16 %v4526_v58, %v4523_v8  ;;  %v1358_v55 = vadd.f32 %v4545_v36, %v4398_v61 }
 0x1bd   : > { %v3535_v22 = vpop.eup %3534  ;;  %v3068_v40 = vpop.f32.mrb[36].mxu0  ;;  %3556 = vtanh.f32 %v1382_v51  ;;  %v2137_v25 = vmul.f32 %v3533_v32, %v4281_v46  ;;  %v1390_v32 = vadd.f32 %v4611_v49, %v4398_v61  ;;  %v1350_v49 = vadd.f32 %v4398_v61, %v4550_v33  ;;  %v5465_v33 = vld [vmem:[#allocation25_spill] sm:$0xff] }
 0x1be   : > { %5458 = vst [vmem:[#allocation77_spill] sm:$0xff] %v4716_v4  ;;  %v3537_v10 = vpop.eup %3536  ;;  %v2140_v7 = vmul.f32 %v3535_v22, %v4297_v53  ;;  %v4720_v41 = vpop.permute.xlu0 %1894  ;;  %v1086_v2 = vadd.f32 %v3068_v40, %v4398_v61  ;;  %3558 = vtanh.f32 %v1385_v30  ;;  %3181 = vmatpush3.bf16.msra.mxu1 %v5460_v17  ;;  %v1393_v22 = vadd.f32 %v4624_v42, %v4398_v61  ;;  %v5466_v17 = vld [vmem:[#allocation20_spill] sm:$0xff] }
 0x1bf   : > { %v4724_v63 = vpop.eup %3538  ;;  %v1077_v23 = vpop.f32.mrb[37].mxu0  ;;  %v2138_v34 = vmul.f32 %v3537_v10, %v4283_v47  ;;  %3560 = vtanh.f32 %v1337_v48  ;;  %v5462_v40 = vpack.c.bf16 %v4571_v38, %v4568_v37  ;;  %vm2252_vm6 = vcmp.ge.s32.totalorder %v2243_v0, %v4364_v31 }
 0x1c0   : > { %v4729_v19 = vpop.permute.xlu1 %1898  ;;  %v4731_v52 = vpop.eup %3540  ;;  %v1078_v53 = vadd.f32 %v4398_v61, %v1077_v23  ;;  %v3186_v6 = vpack.c.bf16 %v2140_v7, %v2139_v24  ;;  %3562 = vtanh.f32 %v1086_v2  ;;  %vm2261_vm7 = vcmp.lt.s32.totalorder %v2243_v0, %v4372_v43 }
 0x1c1   : > { %5459 = vst [vmem:[#allocation78_spill] sm:$0xff] %v4729_v19  ;;  %v3069_v35 = vpop.f32.mrb[38].mxu0  ;;  %v4738_v51 = vpop.eup %3542  ;;  %v3182_v14 = vpack.c.bf16 %v2138_v34, %v2137_v25  ;;  %vm4815_vm9 = vmand %vm2252_vm6, %vm2261_vm7 }
 0x1c2   : > { %v1089_v46 = vadd.f32 %v3069_v35, %v4398_v61  ;;  %v1080_v47 = vpop.f32.mrb[39].mxu0  ;;  %v4743_v30 = vpop.eup %3544  ;;  %3564 = vtanh.f32 %v1078_v53 }
 0x1c3   : > { %v1081_v8 = vadd.f32 %v4398_v61, %v1080_v47  ;;  %v1970_v58 = vpop.permute.xlu0 %1969  ;;  %v3547_v20 = vpop.eup %3546  ;;  %3183 = vmatprep.subr.bf16.mxu1 %v3182_v14 }
 0x1c4   : > { %3566 = vtanh.f32 %v1089_v46  ;;  %v1974_v48 = vpop.permute.xlu1 %1973  ;;  %v4751_v10 = vmul.f32 %v4646_v3, %v1970_v58  ;;  %v3549_v36 = vpop.eup %3548  ;;  %3185 = vmatpush3.bf16.msra.mxu1 %v5462_v40  ;;  %v5464_v3 = vld [vmem:[#allocation24_spill] sm:$0xff]  ;;  %v5467_v46 = vld [vmem:[#allocation21_spill] sm:$0xff] }
 0x1c5   : > { %3568 = vtanh.f32 %v1081_v8  ;;  %v4761_v24 = vmul.f32 %v4678_v56, %v1974_v48  ;;  %v3551_v7 = vpop.eup %3550  ;;  %3187 = vmatprep.subr.bf16.mxu1 %v3186_v6  ;;  %v4767_v37 = vpop.f32.mrb[32].mxu1  ;;  %v4770_v2 = vmul.f32 %v3547_v20, %v5464_v3  ;;  %v4783_v6 = vmul.f32 %v3549_v36, %v5466_v17  ;;  %v5469_v20 = vld [vmem:[#allocation62_spill] sm:$0xff]  ;;  %v5479_v36 = vld [vmem:[#allocation32_spill] sm:$0xff] }
 0x1c6   : > { %5461 = vst [vmem:[#allocation79_spill] sm:$0xff] %v4751_v10  ;;  %3570 = vtanh.f32 %v1358_v55  ;;  %v3553_v38 = vpop.eup %3552  ;;  %v3072_v42 = vpop.f32.mrb[40].mxu0  ;;  %v4773_v56 = vmul.f32 %v3551_v7, %v5465_v33 }
 0x1c7   : > { %5463 = vst [vmem:[#allocation80_spill] sm:$0xff] %v4761_v24  ;;  %v4775_v23 = vpop.permute.xlu0 %1902  ;;  %3572 = vtanh.f32 %v1390_v32  ;;  %v4779_v34 = vpop.eup %3554  ;;  %v1102_v53 = vadd.f32 %v3072_v42, %v4398_v61  ;;  %v4786_v47 = vmul.f32 %v3553_v38, %v5467_v46  ;;  %v5468_v32 = vld [vmem:[#allocation63_spill] sm:$0xff]  ;;  %v5482_v24 = vld [vmem:[#allocation29_spill] sm:$0xff] }
 0x1c8   : > { %v1093_v35 = vpop.f32.mrb[41].mxu0  ;;  %v4788_v14 = vpop.permute.xlu1 %1906  ;;  %3574 = vtanh.f32 %v1393_v22  ;;  %v5470_v48 = vpack.c.bf16 %v5468_v32, %v5469_v20  ;;  %v5475_v20 = vmov 1.0  }
 0x1c9   : > { %v3557_v55 = vpop.eup %3556  ;;  %v1094_v8 = vadd.f32 %v4398_v61, %v1093_v35  ;;  %v3073_v58 = vpop.f32.mrb[42].mxu0  ;;  %3576 = vtanh.f32 %v1350_v49  ;;  %v1398_v49 = vadd.f32 %v4398_v61, %v4658_v45 }
 0x1ca   : > { %3189 = vmatpush3.bf16.msra.mxu1 %v5470_v48  ;;  %v4806_v40 = vpop.f32.mrb[33].mxu1  ;;  %v3559_v7 = vpop.eup %3558  ;;  %3578 = vtanh.f32 %v1102_v53  ;;  %v1105_v38 = vadd.f32 %v3073_v58, %v4398_v61  ;;  %v1401_v58 = vadd.f32 %v4398_v61, %v4672_v39 }
 0x1cb   : > { %v1096_v42 = vpop.f32.mrb[43].mxu0  ;;  %v4821_v35 = vpop.f32.mrb[34].mxu1  ;;  %3580 = vtanh.f32 %v1094_v8  ;;  %v5477_v8 = vld [vmem:[#allocation60_spill] sm:$0xff] }
 0x1cc   : > { %v4823_v53 = vpop.eup %3560  ;;  %v1097_v17 = vadd.f32 %v4398_v61, %v1096_v42  ;;  %v2048_v46 = vpop.permute.xlu0 %2047  ;;  %3582 = vtanh.f32 %v1105_v38  ;;  %v1361_v39 = vadd.f32 %v5477_v8, %v4398_v61  ;;  %v5481_v8 = vld [vmem:[#allocation28_spill] sm:$0xff] }
 0x1cd   : > { %v4828_v32 = vpop.f32.mrb[35].mxu1  ;;  %v3563_v0 = vpop.eup %3562  ;;  %2789 = vmatmul.mubr.msk.f32.vlgmr.msra.gmra.mrb[36].mxu1 %vm4800_vm8, %v5475_v20  ;;  %v4833_v48 = vmul.f32 %v3557_v55, %v2048_v46  ;;  %v5480_v55 = vld [vmem:[#allocation33_spill] sm:$0xff] }
 0x1ce   : > { %v2052_v45 = vpop.permute.xlu1 %2051  ;;  %v3565_v25 = vpop.eup %3564  ;;  %3584 = vtanh.f32 %v1097_v17  ;;  %2790 = vmatprep.mubr.msk.f32.mxu1 %vm4815_vm9, %v5475_v20  ;;  %v4843_v3 = vmul.f32 %v3563_v0, %v5479_v36  ;;  %vm2569_vm9 = vcmask 7168  }
 0x1cf   : > { %5476 = vst [vmem:[#allocation24_spill] sm:$0xff] %v4833_v48  ;;  %v4840_v42 = vmul.f32 %v3559_v7, %v2052_v45  ;;  %v3567_v62 = vpop.eup %3566  ;;  %3586 = vtanh.f32 %v1398_v49  ;;  %v3076_v22 = vpop.f32.mrb[44].mxu0  ;;  %v4854_v49 = vmul.f32 %v3565_v25, %v5481_v8 }
 0x1d0   : > { %v3569_v38 = vpop.eup %3568  ;;  %v4846_v46 = vmul.f32 %v3567_v62, %v5480_v55  ;;  %v1981_v17 = vpop.permute.xlu0 %1980  ;;  %3588 = vtanh.f32 %v1401_v58  ;;  %v1118_v7 = vadd.f32 %v3076_v22, %v4398_v61 }
 0x1d1   : > { %5478 = vst [vmem:[#allocation25_spill] sm:$0xff] %v4840_v42  ;;  %v4850_v10 = vpop.eup %3570  ;;  %v1109_v45 = vpop.f32.mrb[45].mxu0  ;;  %v4857_v59 = vmul.f32 %v3569_v38, %v5482_v24  ;;  %v4860_v62 = vmul.f32 %v4696_v57, %v1981_v17  ;;  %3590 = vtanh.f32 %v1361_v39  ;;  %v1406_v17 = vadd.f32 %v4651_v18, %v4398_v61  ;;  %v5486_v18 = vld [vmem:[#allocation61_spill] sm:$0xff] }
 0x1d2   : > { %v1985_v0 = vpop.permute.xlu1 %1984  ;;  %v3573_v36 = vpop.eup %3572  ;;  %v1110_v58 = vadd.f32 %v4398_v61, %v1109_v45  ;;  %3592 = vtanh.f32 %v1118_v7  ;;  %v1353_v48 = vadd.f32 %v4398_v61, %v5486_v18  ;;  %v5489_v7 = vld [vmem:[#allocation41_spill] sm:$0xff] }
 0x1d3   : > { %5483 = vst [vmem:[#allocation20_spill] sm:$0xff] %v4860_v62  ;;  %v3077_v55 = vpop.f32.mrb[46].mxu0  ;;  %v4866_v22 = vmul.f32 %v4731_v52, %v1985_v0  ;;  %v3575_v25 = vpop.eup %3574  ;;  %v1409_v52 = vadd.f32 %v4664_v50, %v4398_v61  ;;  %v5488_v50 = vld [vmem:[#allocation40_spill] sm:$0xff] }
 0x1d4   : > { %v1121_v24 = vadd.f32 %v3077_v55, %v4398_v61  ;;  %v1112_v38 = vpop.f32.mrb[47].mxu0  ;;  %v4873_v45 = vpop.eup %3576  ;;  %3594 = vtanh.f32 %v1110_v58 }
 0x1d5   : > { %5484 = vst [vmem:[#allocation21_spill] sm:$0xff] %v4866_v22  ;;  %v1113_v8 = vadd.f32 %v4398_v61, %v1112_v38  ;;  %v2056_v39 = vpop.permute.xlu0 %2055  ;;  %v3579_v0 = vpop.eup %3578 }
 0x1d6   : > { %3596 = vtanh.f32 %v1121_v24  ;;  %v2060_v55 = vpop.permute.xlu1 %2059  ;;  %v4880_v33 = vmul.f32 %v3573_v36, %v2056_v39  ;;  %v3581_v57 = vpop.eup %3580  ;;  %v4887_v11 = vmul.f32 %v3579_v0, %v5488_v50 }
 0x1d7   : > { %3598 = vtanh.f32 %v1113_v8  ;;  %v4884_v58 = vmul.f32 %v3575_v25, %v2060_v55  ;;  %v3583_v38 = vpop.eup %3582  ;;  %v3080_v4 = vpop.f32.mrb[48].mxu0  ;;  %v5490_v55 = vld [vmem:[#allocation36_spill] sm:$0xff] }
 0x1d8   : > { %5485 = vst [vmem:[#allocation63_spill] sm:$0xff] %v4880_v33  ;;  %3600 = vtanh.f32 %v1406_v17  ;;  %v3585_v42 = vpop.eup %3584  ;;  %v4890_v62 = vmul.f32 %v3583_v38, %v5489_v7  ;;  %v1134_v39 = vadd.f32 %v3080_v4, %v4398_v61  ;;  %v1125_v25 = vpop.f32.mrb[49].mxu0  ;;  %v4896_v18 = vmul.f32 %v3581_v57, %v5490_v55  ;;  %v5491_v17 = vld [vmem:[#allocation37_spill] sm:$0xff] }
 0x1d9   : > { %5487 = vst [vmem:[#allocation62_spill] sm:$0xff] %v4884_v58  ;;  %v1989_v24 = vpop.permute.xlu0 %1988  ;;  %3602 = vtanh.f32 %v1409_v52  ;;  %v3587_v8 = vpop.eup %3586  ;;  %v4899_v22 = vmul.f32 %v3585_v42, %v5491_v17  ;;  %v1126_v52 = vadd.f32 %v4398_v61, %v1125_v25 }
 0x1da   : > { %v4902_v0 = vmul.f32 %v4689_v54, %v1989_v24  ;;  %v1993_v7 = vpop.permute.xlu1 %1992  ;;  %v3589_v38 = vpop.eup %3588  ;;  %3604 = vtanh.f32 %v1353_v48  ;;  %v1414_v24 = vadd.f32 %v4398_v61, %v4701_v9  ;;  %v1417_v48 = vadd.f32 %v4398_v61, %v4714_v21  ;;  %v5495_v9 = vld [vmem:[#allocation66_spill] sm:$0xff]  ;;  %v5498_v21 = vld [vmem:[#allocation49_spill] sm:$0xff] }
 0x1db   : > { %v3081_v50 = vpop.f32.mrb[50].mxu0  ;;  %v4908_v4 = vmul.f32 %v4724_v63, %v1993_v7  ;;  %3606 = vtanh.f32 %v1134_v39  ;;  %v4915_v55 = vpop.eup %3590  ;;  %v1374_v54 = vadd.f32 %v5495_v9, %v4398_v61 }
 0x1dc   : > { %5492 = vst [vmem:[#allocation60_spill] sm:$0xff] %v4902_v0  ;;  %v1137_v57 = vadd.f32 %v3081_v50, %v4398_v61  ;;  %v1128_v42 = vpop.f32.mrb[51].mxu0  ;;  %3608 = vtanh.f32 %v1126_v52  ;;  %v3593_v39 = vpop.eup %3592  ;;  %v5497_v0 = vld [vmem:[#allocation48_spill] sm:$0xff] }
 0x1dd   : > { %5493 = vst [vmem:[#allocation32_spill] sm:$0xff] %v4908_v4  ;;  %v1129_v25 = vadd.f32 %v4398_v61, %v1128_v42  ;;  %v2064_v17 = vpop.permute.xlu0 %2063  ;;  %v3084_v63 = vpop.f32.mrb[52].mxu0  ;;  %v4929_v4 = vmul.f32 %v3593_v39, %v5497_v0 }
 0x1de   : > { %3610 = vtanh.f32 %v1137_v57  ;;  %v2068_v7 = vpop.permute.xlu1 %2067  ;;  %v4922_v50 = vmul.f32 %v3587_v8, %v2064_v17  ;;  %v3595_v36 = vpop.eup %3594  ;;  %v1150_v17 = vadd.f32 %v3084_v63, %v4398_v61 }
 0x1df   : > { %3612 = vtanh.f32 %v1129_v25  ;;  %v4926_v52 = vmul.f32 %v3589_v38, %v2068_v7  ;;  %v1141_v38 = vpop.f32.mrb[53].mxu0  ;;  %v5499_v7 = vld [vmem:[#allocation44_spill] sm:$0xff] }
 0x1e0   : > { %5494 = vst [vmem:[#allocation33_spill] sm:$0xff] %v4922_v50  ;;  %v3597_v42 = vpop.eup %3596  ;;  %3614 = vtanh.f32 %v1414_v24  ;;  %v4938_v9 = vmul.f32 %v3595_v36, %v5499_v7  ;;  %v5500_v24 = vld [vmem:[#allocation45_spill] sm:$0xff] }
 0x1e1   : > { %5496 = vst [vmem:[#allocation28_spill] sm:$0xff] %v4926_v52  ;;  %v3599_v33 = vpop.eup %3598  ;;  %v4932_v58 = vmul.f32 %v3597_v42, %v5498_v21  ;;  %v1997_v57 = vpop.permute.xlu0 %1996  ;;  %3616 = vtanh.f32 %v1417_v48  ;;  %v1142_v48 = vadd.f32 %v4398_v61, %v1141_v38  ;;  %v5505_v52 = vld [vmem:[#allocation23_spill] sm:$0xff] }
 0x1e2   : > { %v3601_v25 = vpop.eup %3600  ;;  %v4941_v5 = vmul.f32 %v3599_v33, %v5500_v24  ;;  %v4944_v0 = vmul.f32 %v4743_v30, %v1997_v57  ;;  %v2001_v39 = vpop.permute.xlu1 %2000  ;;  %3618 = vtanh.f32 %v1374_v54  ;;  %v4955_v33 = vld [vmem:[%s5355_s3] ss:$0 sm:$0xff] }
 0x1e3   : > { %v3603_v42 = vpop.eup %3602  ;;  %v3085_v21 = vpop.f32.mrb[54].mxu0  ;;  %v4950_v63 = vmul.f32 %v4823_v53, %v2001_v39  ;;  %3620 = vtanh.f32 %v1150_v17  ;;  %v1422_v57 = vadd.f32 %v4955_v33, %v4694_v13  ;;  %v1425_v7 = vadd.f32 %v4955_v33, %v4705_v26  ;;  %v5503_v13 = vld [vmem:[#allocation68_spill] sm:$0xff] }
 0x1e4   : > { %5501 = vst [vmem:[#allocation29_spill] sm:$0xff] %v4944_v0  ;;  %v1153_v30 = vadd.f32 %v4955_v33, %v3085_v21  ;;  %v1144_v36 = vpop.f32.mrb[55].mxu0  ;;  %v4962_v38 = vpop.eup %3604  ;;  %3622 = vtanh.f32 %v1142_v48  ;;  %v1366_v61 = vadd.f32 %v4955_v33, %v5503_v13  ;;  %v5504_v0 = vld [vmem:[#allocation22_spill] sm:$0xff] }
 0x1e5   : > { %5502 = vst [vmem:[#allocation61_spill] sm:$0xff] %v4950_v63  ;;  %v1145_v53 = vadd.f32 %v4955_v33, %v1144_v36  ;;  %v2072_v17 = vpop.permute.xlu0 %2071  ;;  %v3607_v24 = vpop.eup %3606  ;;  %v5506_v13 = vld [vmem:[#allocation18_spill] sm:$0xff] }
 0x1e6   : > { %3624 = vtanh.f32 %v1153_v30  ;;  %v2076_v39 = vpop.permute.xlu1 %2075  ;;  %v4969_v21 = vmul.f32 %v3601_v25, %v2072_v17  ;;  %v3609_v8 = vpop.eup %3608  ;;  %v2159_v63 = vmul.f32 %v3607_v24, %v5504_v0 }
 0x1e7   : > { %3626 = vtanh.f32 %v1145_v53  ;;  %v4973_v48 = vmul.f32 %v3603_v42, %v2076_v39  ;;  %v3088_v54 = vpop.f32.mrb[56].mxu0  ;;  %v2157_v42 = vmul.f32 %v3609_v8, %v5506_v13  ;;  %v5507_v39 = vld [vmem:[#allocation19_spill] sm:$0xff] }
 0x1e8   : > { %v3611_v36 = vpop.eup %3610  ;;  %3628 = vtanh.f32 %v1422_v57  ;;  %v1166_v53 = vadd.f32 %v4955_v33, %v3088_v54  ;;  %v1157_v17 = vpop.f32.mrb[57].mxu0 }
 0x1e9   : > { %v3613_v50 = vpop.eup %3612  ;;  %v2160_v26 = vmul.f32 %v3611_v36, %v5505_v52  ;;  %v2005_v1 = vpop.permute.xlu0 %2004  ;;  %3630 = vtanh.f32 %v1425_v7  ;;  %v1158_v52 = vadd.f32 %v4955_v33, %v1157_v17 }
 0x1ea   : > { %v3615_v30 = vpop.eup %3614  ;;  %v2158_v16 = vmul.f32 %v3613_v50, %v5507_v39  ;;  %v4983_v57 = vmul.f32 %v4738_v51, %v2005_v1  ;;  %v2009_v19 = vpop.permute.xlu1 %2008  ;;  %3632 = vtanh.f32 %v1366_v61  ;;  %v1430_v50 = vadd.f32 %v4955_v33, %v4806_v40 }
 0x1eb   : > { %v3617_v0 = vpop.eup %3616  ;;  %v3089_v24 = vpop.f32.mrb[58].mxu0  ;;  %v3194_v7 = vpack.c.bf16 %v2160_v26, %v2159_v63  ;;  %v4987_v36 = vmul.f32 %v4779_v34, %v2009_v19  ;;  %3634 = vtanh.f32 %v1166_v53  ;;  %v1433_v19 = vadd.f32 %v4955_v33, %v4828_v32 }
 0x1ec   : > { %v1169_v54 = vadd.f32 %v4955_v33, %v3089_v24  ;;  %v1160_v25 = vpop.f32.mrb[59].mxu0  ;;  %v3190_v8 = vpack.c.bf16 %v2158_v16, %v2157_v42  ;;  %v4992_v1 = vpop.eup %3618  ;;  %3636 = vtanh.f32 %v1158_v52  ;;  %v5508_v40 = vpack.c.bf16 %v4786_v47, %v4783_v6  ;;  %v5510_v52 = vld [vmem:[#allocation30_spill] sm:$0xff]  ;;  %v5538_v6 = vld [vmem:[#allocation55_spill] sm:$0xff] }
 0x1ed   : > { %v1161_v51 = vadd.f32 %v4955_v33, %v1160_v25  ;;  %v2080_v61 = vpop.permute.xlu0 %2079  ;;  %v3621_v34 = vpop.eup %3620  ;;  %v5509_v25 = vld [vmem:[#allocation71_spill] sm:$0xff] }
 0x1ee   : > { %3638 = vtanh.f32 %v1169_v54  ;;  %3191 = vmatprep.subr.bf16.mxu1 %v3190_v8  ;;  %v2084_v26 = vpop.permute.xlu1 %2083  ;;  %v4999_v16 = vmul.f32 %v3615_v30, %v2080_v61  ;;  %v3623_v53 = vpop.eup %3622  ;;  %v1369_v17 = vadd.f32 %v4955_v33, %v5509_v25  ;;  %v2163_v24 = vmul.f32 %v3621_v34, %v5510_v52  ;;  %v5511_v30 = vld [vmem:[#allocation31_spill] sm:$0xff] }
 0x1ef   : > { %3640 = vtanh.f32 %v1161_v51  ;;  %3193 = vmatpush3.bf16.msra.mxu1 %v5508_v40  ;;  %v5006_v13 = vmul.f32 %v3617_v0, %v2084_v26  ;;  %v3092_v39 = vpop.f32.mrb[60].mxu0  ;;  %v5512_v0 = vld [vmem:[#allocation26_spill] sm:$0xff]  ;;  %v5513_v40 = vld [vmem:[#allocation27_spill] sm:$0xff] }
 0x1f0   : > { %v3625_v42 = vpop.eup %3624  ;;  %3195 = vmatprep.subr.bf16.mxu1 %v3194_v7  ;;  %3642 = vtanh.f32 %v1430_v50  ;;  %v1182_v51 = vadd.f32 %v4955_v33, %v3092_v39  ;;  %v1173_v61 = vpop.f32.mrb[61].mxu0  ;;  %v2161_v26 = vmul.f32 %v3623_v53, %v5512_v0 }
 0x1f1   : > { %v3627_v32 = vpop.eup %3626  ;;  %v2164_v54 = vmul.f32 %v3625_v42, %v5511_v30  ;;  %v2013_v8 = vpop.permute.xlu0 %2012  ;;  %3644 = vtanh.f32 %v1433_v19  ;;  %v1174_v42 = vadd.f32 %v4955_v33, %v1173_v61  ;;  %v5514_v19 = vpack.c.bf16 %v4773_v56, %v4770_v2 }
 0x1f2   : > { %v3629_v47 = vpop.eup %3628  ;;  %v2162_v7 = vmul.f32 %v3627_v32, %v5513_v40  ;;  %v5016_v50 = vmul.f32 %v4873_v45, %v2013_v8  ;;  %v2017_v25 = vpop.permute.xlu1 %2016  ;;  %3646 = vtanh.f32 %v1369_v17  ;;  %v1438_v8 = vadd.f32 %v4955_v33, %v4767_v37 }
 0x1f3   : > { %v3631_v34 = vpop.eup %3630  ;;  %v3093_v52 = vpop.f32.mrb[62].mxu0  ;;  %3197 = vmatpush3.bf16.msra.mxu1 %v5514_v19  ;;  %v3202_v30 = vpack.c.bf16 %v2164_v54, %v2163_v24  ;;  %v5023_v39 = vmul.f32 %v4962_v38, %v2017_v25  ;;  %3648 = vtanh.f32 %v1182_v51  ;;  %v1441_v38 = vadd.f32 %v4955_v33, %v4821_v35 }
 0x1f4   : > { %v1185_v53 = vadd.f32 %v4955_v33, %v3093_v52  ;;  %v1176_v32 = vpop.f32.mrb[63].mxu0  ;;  %v3198_v45 = vpack.c.bf16 %v2162_v7, %v2161_v26  ;;  %v5028_v0 = vpop.eup %3632  ;;  %3650 = vtanh.f32 %v1174_v42  ;;  %v5515_v37 = vpack.c.bf16 %v4857_v59, %v4854_v49  ;;  %v5516_v26 = vld [vmem:[#allocation70_spill] sm:$0xff] }
 0x1f5   : > { %v1177_v61 = vadd.f32 %v4955_v33, %v1176_v32  ;;  %v2088_v56 = vpop.permute.xlu0 %2087  ;;  %v3635_v17 = vpop.eup %3634  ;;  %v1377_v40 = vadd.f32 %v4955_v33, %v5516_v26  ;;  %v5517_v52 = vld [vmem:[#allocation38_spill] sm:$0xff] }
 0x1f6   : > { %3652 = vtanh.f32 %v1185_v53  ;;  %3199 = vmatprep.subr.bf16.mxu1 %v3198_v45  ;;  %v2092_v24 = vpop.permute.xlu1 %2091  ;;  %v5035_v54 = vmul.f32 %v3629_v47, %v2088_v56  ;;  %v3637_v51 = vpop.eup %3636  ;;  %v2167_v19 = vmul.f32 %v3635_v17, %v5517_v52  ;;  %v5518_v47 = vld [vmem:[#allocation39_spill] sm:$0xff]  ;;  %v5539_v59 = vld [vmem:[#allocation50_spill] sm:$0xff] }
 0x1f7   : > { %3654 = vtanh.f32 %v1177_v61  ;;  %3201 = vmatpush3.bf16.msra.mxu1 %v5515_v37  ;;  %v5042_v7 = vmul.f32 %v3631_v34, %v2092_v24  ;;  %v3096_v42 = vpop.f32.mrb[64].mxu0  ;;  %v5519_v34 = vld [vmem:[#allocation34_spill] sm:$0xff]  ;;  %v5520_v24 = vld [vmem:[#allocation35_spill] sm:$0xff] }
 0x1f8   : > { %v3639_v25 = vpop.eup %3638  ;;  %3203 = vmatprep.subr.bf16.mxu1 %v3202_v30  ;;  %3656 = vtanh.f32 %v1438_v8  ;;  %v1198_v45 = vadd.f32 %v4955_v33, %v3096_v42  ;;  %v1189_v61 = vpop.f32.mrb[65].mxu0  ;;  %v2165_v56 = vmul.f32 %v3637_v51, %v5519_v34 }
 0x1f9   : > { %v3641_v35 = vpop.eup %3640  ;;  %v2168_v53 = vmul.f32 %v3639_v25, %v5518_v47  ;;  %v2021_v32 = vpop.permute.xlu0 %2020  ;;  %3658 = vtanh.f32 %v1441_v38  ;;  %v1190_v26 = vadd.f32 %v4955_v33, %v1189_v61  ;;  %v5521_v38 = vpack.c.bf16 %v4846_v46, %v4843_v3 }
 0x1fa   : > { %v3643_v49 = vpop.eup %3642  ;;  %v2166_v30 = vmul.f32 %v3641_v35, %v5520_v24  ;;  %v5052_v8 = vmul.f32 %v4850_v10, %v2021_v32  ;;  %v2025_v37 = vpop.permute.xlu1 %2024  ;;  %3660 = vtanh.f32 %v1377_v40 }
 0x1fb   : > { %v3645_v17 = vpop.eup %3644  ;;  %v3097_v25 = vpop.f32.mrb[66].mxu0  ;;  %3205 = vmatpush3.bf16.msra.mxu1 %v5521_v38  ;;  %v3210_v52 = vpack.c.bf16 %v2168_v53, %v2167_v19  ;;  %v5059_v42 = vmul.f32 %v4915_v55, %v2025_v37  ;;  %3662 = vtanh.f32 %v1198_v45  ;;  %v5522_v19 = vpack.c.bf16 %v4899_v22, %v4896_v18  ;;  %v5525_v22 = vld [vmem:[#allocation42_spill] sm:$0xff] }
 0x1fc   : > { %v1201_v51 = vadd.f32 %v4955_v33, %v3097_v25  ;;  %v1192_v35 = vpop.f32.mrb[67].mxu0  ;;  %v3206_v10 = vpack.c.bf16 %v2166_v30, %v2165_v56  ;;  %v3647_v47 = vpop.eup %3646  ;;  %3664 = vtanh.f32 %v1190_v26  ;;  %v5523_v30 = vld [vmem:[#allocation46_spill] sm:$0xff]  ;;  %v5524_v26 = vld [vmem:[#allocation47_spill] sm:$0xff] }
 0x1fd   : > { %v1193_v32 = vadd.f32 %v4955_v33, %v1192_v35  ;;  %v2096_v34 = vpop.permute.xlu0 %2095  ;;  %v3649_v3 = vpop.eup %3648 }
 0x1fe   : > { %3666 = vtanh.f32 %v1201_v51  ;;  %3207 = vmatprep.subr.bf16.mxu1 %v3206_v10  ;;  %v2100_v46 = vpop.permute.xlu1 %2099  ;;  %v5065_v40 = vmul.f32 %v3643_v49, %v2096_v34  ;;  %v3651_v55 = vpop.eup %3650  ;;  %v2171_v37 = vmul.f32 %v3649_v3, %v5523_v30 }
 0x1ff   : > { %3668 = vtanh.f32 %v1193_v32  ;;  %3209 = vmatpush3.bf16.msra.mxu1 %v5522_v19  ;;  %v5070_v53 = vmul.f32 %v3645_v17, %v2100_v46  ;;  %v3100_v24 = vpop.f32.mrb[68].mxu0  ;;  %v2169_v18 = vmul.f32 %v3651_v55, %v5525_v22  ;;  %v5526_v17 = vld [vmem:[#allocation43_spill] sm:$0xff] }
 0x200   : > { %v3653_v45 = vpop.eup %3652  ;;  %3211 = vmatprep.subr.bf16.mxu1 %v3210_v52  ;;  %v1214_v35 = vadd.f32 %v4955_v33, %v3100_v24  ;;  %v1205_v10 = vpop.f32.mrb[69].mxu0  ;;  %v2242_v24 = vadd.s32 256, %v4361_v27 }
 0x201   : > { %v3655_v56 = vpop.eup %3654  ;;  %v2172_v25 = vmul.f32 %v3653_v45, %v5524_v26  ;;  %v2029_v38 = vpop.permute.xlu0 %2028  ;;  %v1206_v3 = vadd.f32 %v4955_v33, %v1205_v10  ;;  %v5527_v45 = vpack.c.bf16 %v4890_v62, %v4887_v11 }
 0x202   : > { %v3657_v51 = vpop.eup %3656  ;;  %v2170_v32 = vmul.f32 %v3655_v56, %v5526_v17  ;;  %v5080_v52 = vmul.f32 %v5028_v0, %v2029_v38  ;;  %v2033_v34 = vpop.permute.xlu1 %2032  ;;  %3670 = vtanh.f32 %v1214_v35  ;;  %v2245_v38 = vadd.s32 640, %v4361_v27 }
 0x203   : > { %v3659_v46 = vpop.eup %3658  ;;  %v3101_v19 = vpop.f32.mrb[70].mxu0  ;;  %3213 = vmatpush3.bf16.msra.mxu1 %v5527_v45  ;;  %v3218_v30 = vpack.c.bf16 %v2172_v25, %v2171_v37  ;;  %v5087_v26 = vmul.f32 %v3647_v47, %v2033_v34  ;;  %3672 = vtanh.f32 %v1206_v3  ;;  %vm2251_vm10 = vcmp.ge.s32.totalorder %v2242_v24, %v4364_v31  ;;  %v5530_v45 = vld [vmem:[#allocation57_spill] sm:$0xff] }
 0x204   : > { %v1217_v55 = vadd.f32 %v4955_v33, %v3101_v19  ;;  %v1208_v56 = vpop.f32.mrb[71].mxu0  ;;  %v3214_v0 = vpack.c.bf16 %v2170_v32, %v2169_v18  ;;  %v3661_v22 = vpop.eup %3660  ;;  %v5528_v18 = vpack.c.bf16 %v4941_v5, %v4938_v9  ;;  %vm2260_vm11 = vcmp.lt.s32.totalorder %v2242_v24, %v4372_v43 }
 0x205   : > { %v1209_v10 = vadd.f32 %v4955_v33, %v1208_v56  ;;  %v2104_v62 = vpop.permute.xlu0 %2103  ;;  %v3663_v37 = vpop.eup %3662  ;;  %vm2254_vm12 = vcmp.ge.s32.totalorder %v2245_v38, %v4364_v31  ;;  %vm2263_vm13 = vcmp.lt.s32.totalorder %v2245_v38, %v4372_v43  ;;  %v5531_v56 = vld [vmem:[#allocation52_spill] sm:$0xff]  ;;  %vm2268_vm14 = vmand %vm2251_vm10, %vm2260_vm11 }
 0x206   : > { %3674 = vtanh.f32 %v1217_v55  ;;  %3215 = vmatprep.subr.bf16.mxu1 %v3214_v0  ;;  %v2108_v47 = vpop.permute.xlu1 %2107  ;;  %v5094_v25 = vmul.f32 %v3657_v51, %v2104_v62  ;;  %v3665_v35 = vpop.eup %3664  ;;  %v5529_v51 = vld [vmem:[#allocation56_spill] sm:$0xff]  ;;  %vm2271_vm15 = vmand %vm2254_vm12, %vm2263_vm13 }
 0x207   : > { %3676 = vtanh.f32 %v1209_v10  ;;  %3217 = vmatpush3.bf16.msra.mxu1 %v5528_v18  ;;  %v5099_v17 = vmul.f32 %v3659_v46, %v2108_v47  ;;  %v3104_v3 = vpop.f32.mrb[72].mxu0  ;;  %v5105_v19 = vmul.f32 %v3663_v37, %v5529_v51  ;;  %v5115_v0 = vmul.f32 %v3665_v35, %v5531_v56  ;;  %v5532_v10 = vld [vmem:[#allocation53_spill] sm:$0xff] }
 0x208   : > { %v3667_v32 = vpop.eup %3666  ;;  %3219 = vmatprep.subr.bf16.mxu1 %v3218_v30  ;;  %v1230_v46 = vadd.f32 %v4955_v33, %v3104_v3  ;;  %v1221_v30 = vpop.f32.mrb[73].mxu0  ;;  %v5533_v51 = vpack.c.bf16 %v4932_v58, %v4929_v4 }
 0x209   : > { %v3669_v34 = vpop.eup %3668  ;;  %v5108_v55 = vmul.f32 %v3667_v32, %v5530_v45  ;;  %v2037_v5 = vpop.permute.xlu0 %2036  ;;  %v1222_v18 = vadd.f32 %v4955_v33, %v1221_v30 }
 0x20a   : > { %v5118_v62 = vmul.f32 %v3669_v34, %v5532_v10  ;;  %v5121_v37 = vmul.f32 %v4992_v1, %v2037_v5  ;;  %v2041_v47 = vpop.permute.xlu1 %2040  ;;  %v3105_v32 = vpop.f32.mrb[74].mxu0  ;;  %3678 = vtanh.f32 %v1230_v46 }
 0x20b   : > { %3221 = vmatpush3.bf16.msra.mxu1 %v5533_v51  ;;  %v3228_v35 = vpack.c.bf16 %v5108_v55, %v5105_v19  ;;  %v5133_v34 = vmul.f32 %v3661_v22, %v2041_v47  ;;  %v1233_v1 = vadd.f32 %v4955_v33, %v3105_v32  ;;  %v1224_v3 = vpop.f32.mrb[75].mxu0  ;;  %3680 = vtanh.f32 %v1222_v18  ;;  %v5534_v18 = vld [vmem:[#allocation64_spill] sm:$0xff]  ;;  %v5535_v51 = vld [vmem:[#allocation65_spill] sm:$0xff] }
 0x20c   : > { %v3224_v45 = vpack.c.bf16 %v5118_v62, %v5115_v0  ;;  %v1225_v58 = vadd.f32 %v4955_v33, %v1224_v3  ;;  %v3671_v24 = vpop.eup %3670  ;;  %v3108_v30 = vpop.f32.mrb[76].mxu0  ;;  %v5548_v19 = vld [vmem:[#allocation73_spill] sm:$0xff] }
 0x20d   : > { %3682 = vtanh.f32 %v1233_v1  ;;  %v3673_v22 = vpop.eup %3672  ;;  %v5148_v38 = vmul.f32 %v3671_v24, %v4600_v44  ;;  %v1246_v10 = vadd.f32 %v4955_v33, %v3108_v30  ;;  %v1237_v47 = vpop.f32.mrb[77].mxu0 }
 0x20e   : > { %2791 = vmatmul.mubr.msk.f32.vlgmr.msra.gmra.mrb[38].mxu1 %vm2268_vm14, %v5475_v20  ;;  %3684 = vtanh.f32 %v1225_v58  ;;  %v5155_v32 = vmul.f32 %v3673_v22, %v5534_v18  ;;  %v1238_v3 = vadd.f32 %v4955_v33, %v1237_v47  ;;  %v3109_v58 = vpop.f32.mrb[78].mxu0 }
 0x20f   : > { %2792 = vmatprep.mubr.msk.f32.mxu1 %vm2271_vm15, %v5475_v20  ;;  %3686 = vtanh.f32 %v1246_v10  ;;  %v1249_v44 = vadd.f32 %v4955_v33, %v3109_v58 }
 0x210   : > { %v3675_v5 = vpop.eup %3674  ;;  %3688 = vtanh.f32 %v1238_v3 }
 0x211   : > { %v3677_v46 = vpop.eup %3676  ;;  %v5151_v56 = vmul.f32 %v3675_v5, %v4605_v60  ;;  %v1240_v60 = vpop.f32.mrb[79].mxu0  ;;  %3690 = vtanh.f32 %v1249_v44 }
 0x212   : > { %v5158_v1 = vmul.f32 %v3677_v46, %v5535_v51  ;;  %v1241_v22 = vadd.f32 %v4955_v33, %v1240_v60  ;;  %v3112_v18 = vpop.f32.mrb[80].mxu0 }
 0x213   : > { %v1262_v58 = vadd.f32 %v4955_v33, %v3112_v18  ;;  %v1253_v9 = vpop.f32.mrb[81].mxu0 }
 0x214   : > { %v3232_v24 = vpack.c.bf16 %v5158_v1, %v5155_v32  ;;  %v3679_v5 = vpop.eup %3678  ;;  %3692 = vtanh.f32 %v1241_v22  ;;  %v1254_v44 = vadd.f32 %v4955_v33, %v1253_v9  ;;  %v3113_v22 = vpop.f32.mrb[82].mxu0 }
 0x215   : > { %v3681_v46 = vpop.eup %3680  ;;  %v5168_v51 = vmul.f32 %v3679_v5, %v4676_v28  ;;  %3694 = vtanh.f32 %v1262_v58  ;;  %v1265_v28 = vadd.f32 %v4955_v33, %v3113_v22 }
 0x216   : > { %v5175_v3 = vmul.f32 %v3681_v46, %v4635_v12  ;;  %3696 = vtanh.f32 %v1254_v44 }
 0x217   : > { %v3683_v30 = vpop.eup %3682  ;;  %3698 = vtanh.f32 %v1265_v28 }
 0x218   : > { %v3685_v47 = vpop.eup %3684  ;;  %v5171_v10 = vmul.f32 %v3683_v30, %v4683_v29  ;;  %v1256_v29 = vpop.f32.mrb[83].mxu0 }
 0x219   : > { %v5178_v60 = vmul.f32 %v3685_v47, %v4640_v15  ;;  %v1257_v12 = vadd.f32 %v4955_v33, %v1256_v29  ;;  %v3687_v46 = vpop.eup %3686  ;;  %v5536_v29 = vld [vmem:[#allocation78_spill] sm:$0xff] }
 0x21a   : > { %v3689_v15 = vpop.eup %3688  ;;  %v3116_v47 = vpop.f32.mrb[84].mxu0  ;;  %v5188_v18 = vmul.f32 %v3687_v46, %v4775_v23  ;;  %v5551_v1 = vpack.c.bf16 %v5171_v10, %v5168_v51  ;;  %v5559_v10 = vld [vmem:[#allocation25_spill] sm:$0xff] }
 0x21b   : > { %3700 = vtanh.f32 %v1257_v12  ;;  %v3691_v30 = vpop.eup %3690  ;;  %v1278_v22 = vadd.f32 %v4955_v33, %v3116_v47  ;;  %v1269_v49 = vpop.f32.mrb[85].mxu0  ;;  %v5195_v44 = vmul.f32 %v3689_v15, %v4720_v41  ;;  %v5550_v32 = vpack.c.bf16 %v5178_v60, %v5175_v3  ;;  %v5560_v3 = vld [vmem:[#allocation24_spill] sm:$0xff] }
 0x21c   : > { %v5191_v58 = vmul.f32 %v3691_v30, %v4788_v14  ;;  %v1270_v28 = vadd.f32 %v4955_v33, %v1269_v49  ;;  %v3117_v12 = vpop.f32.mrb[86].mxu0  ;;  %v5561_v60 = vpack.c.bf16 %v5559_v10, %v5560_v3 }
 0x21d   : > { %3702 = vtanh.f32 %v1278_v22  ;;  %v1281_v23 = vadd.f32 %v4955_v33, %v3117_v12  ;;  %v1272_v14 = vpop.f32.mrb[87].mxu0 }
 0x21e   : > { %v3693_v9 = vpop.eup %3692  ;;  %3704 = vtanh.f32 %v1270_v28  ;;  %v1273_v41 = vadd.f32 %v4955_v33, %v1272_v14  ;;  %v5558_v51 = vpack.c.bf16 %v5191_v58, %v5188_v18  ;;  %v5568_v18 = vld [vmem:[#allocation32_spill] sm:$0xff] }
 0x21f   : > { %v5198_v61 = vmul.f32 %v3693_v9, %v5536_v29  ;;  %v3695_v15 = vpop.eup %3694  ;;  %3706 = vtanh.f32 %v1281_v23  ;;  %v5537_v29 = vld [vmem:[#allocation54_spill] sm:$0xff]  ;;  %v5569_v58 = vld [vmem:[#allocation60_spill] sm:$0xff] }
 0x220   : > { %v3697_v30 = vpop.eup %3696  ;;  %3708 = vtanh.f32 %v1273_v41  ;;  %v2191_v2 = vmul.f32 %v3695_v15, %v5537_v29 }
 0x221   : > { %v3248_v46 = vpack.c.bf16 %v5198_v61, %v5195_v44  ;;  %v3699_v9 = vpop.eup %3698  ;;  %v2189_v11 = vmul.f32 %v3697_v30, %v5539_v59  ;;  %v5540_v61 = vld [vmem:[#allocation51_spill] sm:$0xff] }
 0x222   : > { %v3120_v47 = vpop.f32.mrb[88].mxu0  ;;  %v2192_v22 = vmul.f32 %v3699_v9, %v5538_v6  ;;  %v5541_v59 = vld [vmem:[#allocation67_spill] sm:$0xff] }
 0x223   : > { %v1294_v12 = vadd.f32 %v4955_v33, %v3120_v47  ;;  %v1285_v63 = vpop.f32.mrb[89].mxu0 }
 0x224   : > { %v1286_v28 = vadd.f32 %v4955_v33, %v1285_v63  ;;  %v3121_v14 = vpop.f32.mrb[90].mxu0  ;;  %v3226_v23 = vpack.c.bf16 %v2192_v22, %v2191_v2  ;;  %v5544_v22 = vld [vmem:[#allocation59_spill] sm:$0xff] }
 0x225   : > { %v3701_v49 = vpop.eup %3700  ;;  %3710 = vtanh.f32 %v1294_v12  ;;  %v1297_v41 = vadd.f32 %v4955_v33, %v3121_v14  ;;  %v1288_v5 = vpop.f32.mrb[91].mxu0 }
 0x226   : > { %v2190_v44 = vmul.f32 %v3701_v49, %v5540_v61  ;;  %3712 = vtanh.f32 %v1286_v28  ;;  %v1289_v15 = vadd.f32 %v4955_v33, %v1288_v5  ;;  %v5542_v49 = vld [vmem:[#allocation69_spill] sm:$0xff]  ;;  %v5545_v61 = vld [vmem:[#allocation74_spill] sm:$0xff]  ;;  %v5546_v28 = vld [vmem:[#allocation75_spill] sm:$0xff] }
 0x227   : > { %v3703_v6 = vpop.eup %3702  ;;  %3714 = vtanh.f32 %v1297_v41 }
 0x228   : > { %v3222_v4 = vpack.c.bf16 %v2190_v44, %v2189_v11  ;;  %v3705_v9 = vpop.eup %3704  ;;  %3716 = vtanh.f32 %v1289_v15  ;;  %v2195_v30 = vmul.f32 %v3703_v6, %v5541_v59  ;;  %v5543_v11 = vld [vmem:[#allocation58_spill] sm:$0xff]  ;;  %v5556_v59 = vld [vmem:[#allocation79_spill] sm:$0xff] }
 0x229   : > { %v3707_v63 = vpop.eup %3706  ;;  %v2193_v29 = vmul.f32 %v3705_v9, %v5543_v11  ;;  %v5553_v9 = vld [vmem:[#allocation76_spill] sm:$0xff]  ;;  %v5565_v11 = vld [vmem:[#allocation62_spill] sm:$0xff] }
 0x22a   : > { %3223 = vmatprep.subr.bf16.mxu1 %v3222_v4  ;;  %v3709_v2 = vpop.eup %3708  ;;  %v2196_v47 = vmul.f32 %v3707_v63, %v5542_v49  ;;  %v5563_v49 = vld [vmem:[#allocation20_spill] sm:$0xff] }
 0x22b   : > { %3225 = vmatpush3.bf16.msra.mxu1 %v3224_v45  ;;  %v2194_v33 = vmul.f32 %v3709_v2, %v5544_v22  ;;  %v2244_v2 = vadd.s32 512, %v4361_v27 }
 0x22c   : > { %3227 = vmatprep.subr.bf16.mxu1 %v3226_v23  ;;  %v3234_v4 = vpack.c.bf16 %v2196_v47, %v2195_v30  ;;  %v5547_v23 = vld [vmem:[#allocation72_spill] sm:$0xff] }
 0x22d   : > { %v3230_v5 = vpack.c.bf16 %v2194_v33, %v2193_v29  ;;  %vm2253_vm0 = vcmp.ge.s32.totalorder %v2244_v2, %v4364_v31  ;;  %vm2262_vm1 = vcmp.lt.s32.totalorder %v2244_v2, %v4372_v43  ;;  %v5566_v29 = vld [vmem:[#allocation63_spill] sm:$0xff]  ;;  %v5570_v33 = vpack.c.bf16 %v5568_v18, %v5569_v58 }
 0x22e   : > { %vm2270_vm4 = vmand %vm2253_vm0, %vm2262_vm1  ;;  %v5567_v22 = vpack.c.bf16 %v5565_v11, %v5566_v29 }
 0x22f   : > { %3229 = vmatpush3.bf16.msra.mxu1 %v3228_v35  ;;  %v3711_v12 = vpop.eup %3710  ;;  %v5549_v35 = vpack.c.bf16 %v5151_v56, %v5148_v38  ;;  %v2247_v38 = vadd.s32 896, %v4361_v27  ;;  %v5555_v56 = vld [vmem:[#allocation80_spill] sm:$0xff] }
 0x230   : > { %3231 = vmatprep.subr.bf16.mxu1 %v3230_v5  ;;  %v3713_v0 = vpop.eup %3712  ;;  %v2199_v44 = vmul.f32 %v3711_v12, %v5545_v61  ;;  %v5557_v30 = vpack.c.bf16 %v5555_v56, %v5556_v59  ;;  %v5572_v5 = vld [vmem:[#allocation33_spill] sm:$0xff]  ;;  %v5577_v61 = vpack.c.bf16 %v4973_v48, %v4969_v21  ;;  %v5582_v21 = vpack.c.bf16 %v5059_v42, %v5052_v8 }
 0x231   : > { %v3715_v62 = vpop.eup %3714  ;;  %v2197_v41 = vmul.f32 %v3713_v0, %v5547_v23  ;;  %vm2256_vm2 = vcmp.ge.s32.totalorder %v2247_v38, %v4364_v31  ;;  %vm2265_vm3 = vcmp.lt.s32.totalorder %v2247_v38, %v4372_v43  ;;  %v5574_v0 = vld [vmem:[#allocation61_spill] sm:$0xff]  ;;  %v5581_v23 = vpack.c.bf16 %v5042_v7, %v5035_v54  ;;  %v2565_v54 = vld [vmem:[#allocation3] sm:$0xff] }
 0x232   : > { %v3717_v45 = vpop.eup %3716  ;;  %v2200_v14 = vmul.f32 %v3715_v62, %v5546_v28  ;;  %vm2273_vm5 = vmand %vm2256_vm2, %vm2265_vm3  ;;  %v5575_v62 = vld [vmem:[#allocation29_spill] sm:$0xff]  ;;  %v5579_v28 = vpack.c.bf16 %v5006_v13, %v4999_v16  ;;  %v5583_v48 = vpack.c.bf16 %v5070_v53, %v5065_v40  ;;  %v5585_v16 = vpack.c.bf16 %v5099_v17, %v5094_v25 }
 0x233   : > { %3233 = vmatpush3.bf16.msra.mxu1 %v3232_v24  ;;  %v2198_v55 = vmul.f32 %v3717_v45, %v5548_v19  ;;  %v5552_v24 = vld [vmem:[#allocation77_spill] sm:$0xff]  ;;  %v5576_v45 = vpack.c.bf16 %v5574_v0, %v5575_v62  ;;  %v5586_v13 = vpack.c.bf16 %v5133_v34, %v5121_v37 }
 0x234   : > { %3235 = vmatprep.subr.bf16.mxu1 %v3234_v4  ;;  %v3242_v15 = vpack.c.bf16 %v2200_v14, %v2199_v44  ;;  %v5554_v63 = vpack.c.bf16 %v5552_v24, %v5553_v9  ;;  %v5571_v4 = vld [vmem:[#allocation28_spill] sm:$0xff]  ;;  %v5578_v44 = vpack.c.bf16 %v4987_v36, %v4983_v57  ;;  %v5580_v14 = vpack.c.bf16 %v5023_v39, %v5016_v50 }
 0x235   : > { %v3238_v6 = vpack.c.bf16 %v2198_v55, %v2197_v41  ;;  %v5573_v12 = vpack.c.bf16 %v5571_v4, %v5572_v5  ;;  %v2246_v57 = vadd.s32 768, %v4361_v27  ;;  %v5584_v36 = vpack.c.bf16 %v5087_v26, %v5080_v52 }
 0x237   : > { %3237 = vmatpush3.bf16.msra.mxu1 %v5549_v35  ;;  %vm2255_vm6 = vcmp.ge.s32.totalorder %v2246_v57, %v4364_v31  ;;  %vm2264_vm7 = vcmp.lt.s32.totalorder %v2246_v57, %v4372_v43  ;;  %v3883_v35 = vmov (!%p2796_p4), 0  }
 0x238   : > { %3239 = vmatprep.subr.bf16.mxu1 %v3238_v6  ;;  %vm2272_vm8 = vmand %vm2255_vm6, %vm2264_vm7  ;;  %3720 = vset.pattern.permute.xlu0 (!%p2796_p4), %v3883_v35 }
 0x23b   : > { %3241 = vmatpush3.bf16.msra.mxu1 %v5550_v32  ;;  %v2567_v7 = vpop.xlane.xlu0 %2566 }
 0x23c   : > { %3243 = vmatprep.subr.bf16.mxu1 %v3242_v15  ;;  %v2568_v8 = vadd.f32 %v2567_v7, %v2565_v54 }
 0x23e   : > { %2570 = vst.msk [vmem:[#allocation3] sm:$0xff] %vm2569_vm9, %v2568_v8 }
 0x23f   : > { %3245 = vmatpush3.bf16.msra.mxu1 %v5551_v1 }
 0x240   : > { %3247 = vmatprep.subr.bf16.mxu1 %v5554_v63 }
 0x243   : > { %3249 = vmatpush3.bf16.msra.mxu1 %v3248_v46  ;;  %v5562_v46 = vld [vmem:[#allocation21_spill] sm:$0xff] }
 0x244   : > { %3251 = vmatprep.subr.bf16.mxu1 %v5557_v30  ;;  %v5564_v47 = vpack.c.bf16 %v5562_v46, %v5563_v49 }
 0x245   : > { %v2575_v55 = vld [vmem:[#allocation3] sm:$0xff] (!%p2796_p4) }
 0x246   : > { %v2576_v15 = vmax.f32 (!%p2796_p4), %v2575_v55, 1e-09 }
 0x247   : > { %3253 = vmatpush3.bf16.msra.mxu1 %v5558_v51 }
 0x248   : > { %3255 = vmatprep.subr.bf16.mxu1 %v5561_v60  ;;  %3721 = vrcp.f32 (!%p2796_p4), %v2576_v15 }
 0x24a   : > { %2793 = vmatmul.mubr.msk.f32.vlgmr.msra.gmra.mrb[40].mxu1 %vm2270_vm4, %v5475_v20 }
 0x24b   : > { %3257 = vmatpush3.bf16.msra.mxu1 %v5564_v47  ;;  %2794 = vmatprep.mubr.msk.f32.mxu1 %vm2273_vm5, %v5475_v20 }
 0x24c   : > { %3259 = vmatprep.subr.bf16.mxu1 %v5567_v22 }
 0x24f   : > { %3261 = vmatpush3.bf16.msra.mxu1 %v5570_v33 }
 0x250   : > { %3263 = vmatprep.subr.bf16.mxu1 %v5573_v12 }
 0x252   : > { %v3722_v6 = vpop.eup (!%p2796_p4), %3721 }
 0x253   : > { %3265 = vmatpush3.bf16.msra.mxu1 %v5576_v45  ;;  %2581 = vperm.xlu0 (!%p2796_p4), %3720, %v3722_v6  }
 0x254   : > { %3267 = vmatprep.subr.bf16.mxu1 %v5577_v61 }
 0x257   : > { %3269 = vmatpush3.bf16.msra.mxu1 %v5578_v44 }
 0x258   : > { %3271 = vmatprep.subr.bf16.mxu1 %v5579_v28 }
 0x25b   : > { %3273 = vmatpush3.bf16.msra.mxu1 %v5580_v14 }
 0x25c   : > { %3275 = vmatprep.subr.bf16.mxu1 %v5581_v23 }
 0x25f   : > { %3277 = vmatpush3.bf16.msra.mxu1 %v5582_v21 }
 0x260   : > { %3279 = vmatprep.subr.bf16.mxu1 %v5583_v48 }
 0x263   : > { %3281 = vmatpush3.bf16.msra.mxu1 %v5584_v36 }
 0x264   : > { %3283 = vmatprep.subr.bf16.mxu1 %v5585_v16 }
 0x267   : > { %3285 = vmatpush3.bf16.msra.mxu1 %v5586_v13 }
 0x26a   : > { %2795 = vmatmul.mubr.msk.f32.vlgmr.msra.gmra.mrb[42].mxu1 %vm2272_vm8, %v5475_v20  ;;  %v2282_v20 = vld [vmem:[#allocation2] sm:$0xff] }
 0x2a0   : > { %v2906_v27 = vpop.f32.mrb[36].mxu1 }
 0x2a1   : > { %v2907_v50 = vpop.f32.mrb[37].mxu1 }
 0x2a2   : > { %v2908_v39 = vadd.f32 %v2907_v50, %v2906_v27 }
 0x2d2   : > { %v2582_v1 = vpop.permute.xlu0 (!%p2796_p4), %2581 }
 0x2e1   : > { %v2941_v42 = vpop.f32.mrb[38].mxu1 }
 0x2e2   : > { %v2942_v40 = vpop.f32.mrb[39].mxu1 }
 0x2e3   : > { %v2943_v31 = vadd.f32 %v2942_v40, %v2941_v42 }
 0x2e5   : > { %v2420_v53 = vadd.f32 %v2943_v31, %v2908_v39 }
 0x31d   : > { %v2976_v43 = vpop.f32.mrb[40].mxu1 }
 0x31e   : > { %v2977_v52 = vpop.f32.mrb[41].mxu1 }
 0x31f   : > { %v2978_v26 = vadd.f32 %v2977_v52, %v2976_v43 }
 0x321   : > { %v2490_v25 = vadd.f32 %v2978_v26, %v2420_v53 }
 0x33d   : > { %v3011_v17 = vpop.f32.mrb[42].mxu1 }
 0x33e   : > { %v3012_v37 = vpop.f32.mrb[43].mxu1 }
 0x33f   : > { %v3013_v34 = vadd.f32 %v3012_v37, %v3011_v17  ;;  %2574 = sbr.rel (%p2796_p4) target bundleno = 1007 (0x3ef), region = 56 }
 0x341   : > { %v2560_v41 = vadd.f32 %v3013_v34, %v2490_v25 }
 0x343   : > { %v2563_v19 = vadd.f32 %v2560_v41, %v2282_v20 }
 0x345   : > { %2564 = vst [vmem:[#allocation2] sm:$0xff] %v2563_v19 }
 0x34c   : > { %v2577_v32 = vld [vmem:[#allocation2] sm:$0xff] }
 0x34d   : > { %v2584_v24 = vmul.f32 %v2582_v1, %v2577_v32 }
 0x34f   : > { %v2585_v9 = vmul.f32 %v2584_v24, %v2584_v24 }
 0x351   : > { %2586 = vadd.xlane.f32.xlu0 %v2585_v9 }
 0x3de   : > { %v2587_v63 = vpop.xlane.xlu0 %2586 }
 0x3df   : > { %v2588_v2 = vmax.f32 %v2587_v63, 1e-24 }
 0x3e1   : > { %3723 = vrsqrt.f32 %v2588_v2 }
 0x3eb   : > { %v3724_v38 = vpop.eup %3723 }
 0x3ec   : > { %v2590_v56 = vmul.f32 %v3724_v38, %v2584_v24 }
 0x3ee   : > { %2591 = vst [vmem:[#allocation10] sm:$0xff] %v2590_v56 }
 0x3ef PF: > { %p3327_p6 = scmp.eq.s32.totalorder %s3939_s21, 1  ;;  %s3884_s18 = smov [#allocation10]  }
 0x3f0   : > { %s2601_s11 = sshll.u32 %s3884_s18, 4  ;;  %s2602_s11 = int_to_ptr.vmem [resolvable:$true] %s2601_s11 }
 0x3f1   : > { %s3781_s25 = scalar_lea.vmem %s2602_s11, 128  ;;  %p3788_p13 = scmp.lt.s32.totalorder %s2602_s11, %s2602_s11 }
 0x3f2   : > { %p3782_p7 = scmp.ne.s32.totalorder %s2602_s11, %s3781_s25  ;;  %p3789_p5 = scmp.lt.s32.totalorder %s3781_s25, %s3781_s25 }
 0x3f4   : > { %p3783_p9 = pnand %p3782_p7, %p3327_p6  ;;  %p3790_p8 = por %p3789_p5, %p3788_p13 }
 0x3f6   : > { %p3784_p11 = pneg %p3783_p9 }
 0x3f8   : > { %p3791_p0 = pnand %p3790_p8, %p3784_p11 }
 0x3fa   : > { %3794 = shalt.err (!%p3791_p0)
}
 0x3fb   : > { %s3795_s0 = scalar_lea.hbm %s5356_s4, 128 }
 0x3fc   : > { %p3796_p10 = scmp.ne.s32.totalorder %s5356_s4, %s3795_s0  ;;  %p3801_p1 = scmp.lt.u32.totalorder %s3795_s0, %s5356_s4 }
 0x3fe   : > { %p3797_p12 = pnand %p3796_p10, %p3327_p6 }
 0x400   : > { %p3798_p3 = pneg %p3797_p12 }
 0x402   : > { %p3803_p2 = pnand %p3801_p1, %p3798_p3 }
 0x404   : > { %3806 = shalt.err (!%p3803_p2)
}
 0x405   : > { %3318 = dma.vmem_to_hbm [thread:$0]  (%p3327_p6), %s2602_s11, 128, %s5356_s4, [#allocation6]  }
 0x406   : > { %3844 = dma.done.wait (%p3327_p6), [#allocation6], 128  }
 0x407   : > { %3846 = vsyncadd (%p3327_p6), [#allocation6], 4294967168 }
 0x408 PF: > { %s21_s20 = sadd.s32 1, %s3869_s20   ;;  %s5587_s15 = smov %s3853_s16 }
 0x409   : > { %p18_p4 = scmp.ge.s32.totalorder %s21_s20, 4   ;;  %s5588_s16 = smov %s3857_s17 }
 0x40a   : > { %s5589_s17 = smov %s3965_s27  ;;  %s5590_s18 = smov %s3865_s19 }
 0x40b   : > { %s5591_s19 = smov %s5593_s22  ;;  %20 = sbr.rel (!%p18_p4) target bundleno = 10 (0xa), region = 104 }
 0x412   :  { %2614 = vsyncpa [#allocation5], 1 }
 0x413   :  { %2616 = vsyncpa [#allocation5 + $0x1], 1 }
 0x414   :  { %2617 = vsyncpa [#allocation8], 1 }
 0x415   :  { %2619 = vsyncpa [#allocation8 + $0x1], 1 }
 0x416   :  { %2620 = vsyncpa [#allocation6], 1 }
 0x417   :  { %2622 = vsyncpa [#allocation6 + $0x1], 1 }

</bundles_post_ra>
